<compile_context>
chip_gen: v7x
topology: tpu7x:2x2x1
jax: 0.10.0
libtpu: 0.0.40
codegen_flags: <defaults>
</compile_context>

<pallas_src>
import functools

import numpy as np
import jax
import jax.numpy as jnp
from jax import lax
from jax.experimental import pallas as pl
from jax.experimental.pallas import tpu as pltpu

PAD = 128  # lane padding on each side of the spatial axis in the VMEM scratch


# ------------------------------ Pallas kernels ------------------------------

def _conv3x3_from_scratch(scr, mask_ref, w_ref, *, HW, W, cout, vterm_ref=None):
    """3x3 "same" conv in channels-major layout.

    scr      : VMEM ref (Cin, HW + 2*PAD) bf16; activation lives at [PAD, PAD+HW),
               padding region is zero.
    w_ref    : ref (9, Cout, Cin) bf16, tap order t = dh*3 + dw.
    mask_ref : ref (9, 1, HW) bf16; 1.0 where the tap's source pixel is in-bounds.
    vterm_ref: optional ref (9, Cout, 1) f32; per-tap contribution of the
               spatially broadcast `v` channels (layer2 only).
    Returns f32 (Cout, HW).
    """
    acc = jnp.zeros((cout, HW), jnp.float32)
    for t in range(9):
        dh, dw = t // 3, t % 3
        delta = (dh - 1) * W + (dw - 1)
        src = scr[:, PAD + delta: PAD + delta + HW]          # (Cin, HW) bf16
        m = mask_ref[t]                                       # (1, HW) bf16
        acc = acc + jnp.dot(w_ref[t], src * m,
                            preferred_element_type=jnp.float32)
        if vterm_ref is not None:
            acc = acc + vterm_ref[t] * m.astype(jnp.float32)  # (Cout,1)*(1,HW)
    return acc


def _layer1_front_kernel(xt_ref, wc1_ref, bc1_ref, wr1_ref, br1_ref, mask_ref,
                         y1_ref, scr, *, HW, W, c_out, c_hid):
    # Conv2d(3, C_o, 2x2, stride 2) + ReLU  (4-tap slab -> one matmul)
    t0 = jnp.dot(wc1_ref[...], xt_ref[...], preferred_element_type=jnp.float32)
    t0 = jnp.maximum(t0 + bc1_ref[...], 0.0)
    # Park bf16 activation in a lane-padded scratch for the shifted 3x3 reads.
    scr[...] = jnp.zeros(scr.shape, scr.dtype)
    scr[:, PAD:PAD + HW] = t0.astype(jnp.bfloat16)
    # ResidualConnect(1x1 (folded) + 3x3) + ReLU
    acc = _conv3x3_from_scratch(scr, mask_ref, wr1_ref, HW=HW, W=W, cout=c_hid)
    y1_ref[...] = jnp.maximum(acc + br1_ref[...], 0.0).astype(jnp.bfloat16)


def _layer2_kernel(y1t_ref, wc3_ref, bc3_ref, wr2_ref, br2_ref, vterm_ref,
                   wc2_ref, bc2_ref, wf_ref, bf_ref, mask_ref,
                   out_ref, scr_r, scr_y, *, HW, W, c_out, c_hid):
    # layer1 tail: Conv2d(C_h, C_o, 2x2, stride 2), no ReLU
    r = jnp.dot(wc3_ref[...], y1t_ref[...], preferred_element_type=jnp.float32)
    r = r + bc3_ref[...]
    scr_r[...] = jnp.zeros(scr_r.shape, scr_r.dtype)
    scr_r[:, PAD:PAD + HW] = r.astype(jnp.bfloat16)

    # layer2 residual on cat([r, v]) + ReLU (1x1 folded, v via vterm)
    acc = _conv3x3_from_scratch(scr_r, mask_ref, wr2_ref, HW=HW, W=W,
                                cout=c_hid, vterm_ref=vterm_ref)
    y = jnp.maximum(acc + br2_ref[...], 0.0)
    scr_y[...] = jnp.zeros(scr_y.shape, scr_y.dtype)
    scr_y[:, PAD:PAD + HW] = y.astype(jnp.bfloat16)

    # Conv2d(C_h, C_o, 3x3, pad 1) + ReLU
    acc2 = _conv3x3_from_scratch(scr_y, mask_ref, wc2_ref, HW=HW, W=W,
                                 cout=c_out)
    y2 = jnp.maximum(acc2 + bc2_ref[...], 0.0)

    # final Conv2d(C_o, C_o, 1x1)
    out = jnp.dot(wf_ref[...], y2.astype(jnp.bfloat16),
                  preferred_element_type=jnp.float32) + bf_ref[...]
    out_ref[...] = out


def _cparams():
    return pltpu.CompilerParams(dimension_semantics=("parallel",),
                                vmem_limit_bytes=32 * 1024 * 1024)


def _layer1_front(kp, xt, masks, B, HW, W, c_out, c_hid):
    kern = functools.partial(_layer1_front_kernel, HW=HW, W=W,
                             c_out=c_out, c_hid=c_hid)
    return pl.pallas_call(
        kern,
        out_shape=jax.ShapeDtypeStruct((B, c_hid, HW), jnp.bfloat16),
        grid=(B,),
        in_specs=[
            pl.BlockSpec((None, 4 * 3, HW), lambda b: (b, 0, 0)),     # x taps
            pl.BlockSpec((c_out, 4 * 3), lambda b: (0, 0)),           # w_c1
            pl.BlockSpec((c_out, 1), lambda b: (0, 0)),               # b_c1
            pl.BlockSpec((9, c_hid, c_out), lambda b: (0, 0, 0)),     # w_r1 (folded)
            pl.BlockSpec((c_hid, 1), lambda b: (0, 0)),               # b_r1
            pl.BlockSpec((9, 1, HW), lambda b: (0, 0, 0)),            # masks
        ],
        out_specs=pl.BlockSpec((None, c_hid, HW), lambda b: (b, 0, 0)),
        scratch_shapes=[pltpu.VMEM((c_out, HW + 2 * PAD), jnp.bfloat16)],
        compiler_params=_cparams(),
    )(xt, kp["w_c1"], kp["b_c1"], kp["w_r1"], kp["b_r1"], masks)


def _layer2(kp, y1t, vterm, masks, B, HW, W, c_out, c_hid):
    kern = functools.partial(_layer2_kernel, HW=HW, W=W,
                             c_out=c_out, c_hid=c_hid)
    return pl.pallas_call(
        kern,
        out_shape=jax.ShapeDtypeStruct((B, c_out, HW), jnp.float32),
        grid=(B,),
        in_specs=[
            pl.BlockSpec((None, 4 * c_hid, HW), lambda b: (b, 0, 0)),  # y1 taps
            pl.BlockSpec((c_out, 4 * c_hid), lambda b: (0, 0)),        # w_c3
            pl.BlockSpec((c_out, 1), lambda b: (0, 0)),                # b_c3
            pl.BlockSpec((9, c_hid, c_out), lambda b: (0, 0, 0)),      # w_r2 (folded)
            pl.BlockSpec((c_hid, 1), lambda b: (0, 0)),                # b_r2
            pl.BlockSpec((None, 9, c_hid, 1), lambda b: (b, 0, 0, 0)), # vterm
            pl.BlockSpec((9, c_out, c_hid), lambda b: (0, 0, 0)),      # w_c2
            pl.BlockSpec((c_out, 1), lambda b: (0, 0)),                # b_c2
            pl.BlockSpec((c_out, c_out), lambda b: (0, 0)),            # w_f (1x1)
            pl.BlockSpec((c_out, 1), lambda b: (0, 0)),                # b_f
            pl.BlockSpec((9, 1, HW), lambda b: (0, 0, 0)),             # masks
        ],
        out_specs=pl.BlockSpec((None, c_out, HW), lambda b: (b, 0, 0)),
        scratch_shapes=[pltpu.VMEM((c_out, HW + 2 * PAD), jnp.bfloat16),
                        pltpu.VMEM((c_hid, HW + 2 * PAD), jnp.bfloat16)],
        compiler_params=_cparams(),
    )(y1t, kp["w_c3"], kp["b_c3"], kp["w_r2"], kp["b_r2"], vterm,
      kp["w_c2"], kp["b_c2"], kp["w_f"], kp["b_f"], masks)


# ------------------------------- glue (JAX) -------------------------------

def _make_masks(H, W):
    """(9, 1, H*W) bf16 in-bounds masks for a 3x3 / pad-1 conv, tap = dh*3+dw."""
    m = np.zeros((9, 1, H * W), np.float32)
    hs, ws = np.meshgrid(np.arange(H), np.arange(W), indexing="ij")
    for dh in range(3):
        for dw in range(3):
            ok = ((hs + dh - 1 >= 0) & (hs + dh - 1 < H) &
                  (ws + dw - 1 >= 0) & (ws + dw - 1 < W))
            m[dh * 3 + dw, 0] = ok.reshape(-1)
    return jnp.asarray(m, dtype=jnp.bfloat16)


def init_raw_params(key, out_ch, hid_ch):
    ks = jax.random.split(key, 14)
    n = lambda k, s, sc=0.05: sc * jax.random.normal(k, s, jnp.float32)
    return {
        "l1_c1_w": n(ks[0], (out_ch, 3, 2, 2)),
        "l1_c1_b": n(ks[1], (out_ch,)),
        "l1_r1_w": n(ks[2], (hid_ch, out_ch, 1, 1)),          # 1x1, no bias
        "l1_r3_w": n(ks[3], (hid_ch, out_ch, 3, 3)),
        "l1_r3_b": n(ks[4], (hid_ch,)),
        "l1_c3_w": n(ks[5], (out_ch, hid_ch, 2, 2)),
        "l1_c3_b": n(ks[6], (out_ch,)),
        "l2_r1_w": n(ks[7], (hid_ch, out_ch + 7, 1, 1)),       # 1x1, no bias
        "l2_r3_w": n(ks[8], (hid_ch, out_ch + 7, 3, 3)),
        "l2_r3_b": n(ks[9], (hid_ch,)),
        "l2_c2_w": n(ks[10], (out_ch, hid_ch, 3, 3)),
        "l2_c2_b": n(ks[11], (out_ch,)),
        "l2_c3_w": n(ks[12], (out_ch, out_ch, 1, 1)),
        "l2_c3_b": n(ks[13], (out_ch,)),
    }


def prep_params(raw):
    """PyTorch-shaped weights -> kernel-layout weights (1x1 folded, bf16)."""
    c_out = raw["l1_c1_w"].shape[0]

    def taps3x3(w):   # (Cout, Cin, 3, 3) -> (9, Cout, Cin), tap = dh*3+dw
        return jnp.transpose(w, (2, 3, 0, 1)).reshape(9, w.shape[0], w.shape[1])

    def taps2x2(w):   # (Cout, Cin, 2, 2) -> (Cout, 4*Cin), col = (i*2+j)*Cin+cin
        return jnp.transpose(w, (0, 2, 3, 1)).reshape(w.shape[0], 4 * w.shape[1])

    # layer1
    w_c1 = taps2x2(raw["l1_c1_w"])
    w_r1 = taps3x3(raw["l1_r3_w"]).at[4].add(raw["l1_r1_w"][:, :, 0, 0])
    w_c3 = taps2x2(raw["l1_c3_w"])
    # layer2 (split Cin into r-part [:c_out] and v-part [c_out:])
    w_r2 = taps3x3(raw["l2_r3_w"][:, :c_out]).at[4].add(
        raw["l2_r1_w"][:, :c_out, 0, 0])
    wv = taps3x3(raw["l2_r3_w"][:, c_out:]).at[4].add(
        raw["l2_r1_w"][:, c_out:, 0, 0])                     # (9, C_h, 7) f32
    w_c2 = taps3x3(raw["l2_c2_w"])
    w_f = raw["l2_c3_w"][:, :, 0, 0]

    bf16 = lambda a: a.astype(jnp.bfloat16)
    col = lambda b: b.reshape(-1, 1).astype(jnp.float32)
    return dict(
        w_c1=bf16(w_c1), b_c1=col(raw["l1_c1_b"]),
        w_r1=bf16(w_r1), b_r1=col(raw["l1_r3_b"]),
        w_c3=bf16(w_c3), b_c3=col(raw["l1_c3_b"]),
        w_r2=bf16(w_r2), b_r2=col(raw["l2_r3_b"]),
        wv=wv.astype(jnp.float32),
        w_c2=bf16(w_c2), b_c2=col(raw["l2_c2_b"]),
        w_f=bf16(w_f), b_f=col(raw["l2_c3_b"]),
    )


def inference_core_inlet(kp, x_nchw, v, c_out, c_hid):
    """Pallas implementation of InferenceCoreInlet.forward(x, v) (NCHW in/out)."""
    B, _, H, W = x_nchw.shape
    H1, W1 = H // 2, W // 2
    H2, W2 = H1 // 2, W1 // 2
    HW1, HW2 = H1 * W1, H2 * W2

    def tap_slab(a):   # (B, C, 2h, 2w) -> (B, 4*C, h*w) bf16, tap-major rows
        t = jnp.stack([a[:, :, i::2, j::2] for i in (0, 1) for j in (0, 1)],
                      axis=1)
        return t.reshape(B, 4 * a.shape[1], -1).astype(jnp.bfloat16)

    xt = tap_slab(x_nchw)                                     # (B, 12, HW1)
    y1 = _layer1_front(kp, xt, _make_masks(H1, W1), B, HW1, W1, c_out, c_hid)
    y1t = tap_slab(y1.reshape(B, c_hid, H1, W1))              # (B, 4*C_h, HW2)

    # Per-tap contribution of the broadcast v channels (exact, f32).
    vterm = jnp.einsum("tco,bo->btc", kp["wv"],
                       v[:, :, 0, 0].astype(jnp.float32)).reshape(B, 9, c_hid, 1)

    out = _layer2(kp, y1t, vterm, _make_masks(H2, W2), B, HW2, W2, c_out, c_hid)
    return out.reshape(B, c_out, H2, W2)                      # NCHW


# --------------------------- pure-JAX reference ---------------------------

def _conv(x, w, b, stride, pad):
    out = lax.conv_general_dilated(
        x, w, window_strides=(stride, stride),
        padding=[(pad, pad), (pad, pad)],
        dimension_numbers=("NCHW", "OIHW", "NCHW"))
    if b is not None:
        out = out + b.reshape(1, -1, 1, 1)
    return out


def reference_forward(raw, x, v):
    y = jax.nn.relu(_conv(x, raw["l1_c1_w"], raw["l1_c1_b"], 2, 0))
    y = jax.nn.relu(_conv(y, raw["l1_r1_w"], None, 1, 0)
                    + _conv(y, raw["l1_r3_w"], raw["l1_r3_b"], 1, 1))
    r = _conv(y, raw["l1_c3_w"], raw["l1_c3_b"], 2, 0)
    sz = r.shape[2]
    z = jnp.concatenate([r, jnp.broadcast_to(v, (v.shape[0], 7, sz, sz))], axis=1)
    y = jax.nn.relu(_conv(z, raw["l2_r1_w"], None, 1, 0)
                    + _conv(z, raw["l2_r3_w"], raw["l2_r3_b"], 1, 1))
    y = jax.nn.relu(_conv(y, raw["l2_c2_w"], raw["l2_c2_b"], 1, 1))
    return _conv(y, raw["l2_c3_w"], raw["l2_c3_b"], 1, 0)


# --------------------------------- main ------------------------------------

if __name__ == "__main__":
    OUT_CH, HID_CH = 16, 32          # small variants of the (64, 128) defaults
    B, H, W = 2, 16, 16

    key = jax.random.PRNGKey(0)
    kx, kv, kparam = jax.random.split(key, 3)
    x = jax.random.normal(kx, (B, 3, H, W), jnp.float32)
    v = jax.random.normal(kv, (B, 7, 1, 1), jnp.float32)

    raw = init_raw_params(kparam, OUT_CH, HID_CH)
    kp = prep_params(raw)

    fwd = jax.jit(lambda p, xx, vv: inference_core_inlet(p, xx, vv, OUT_CH, HID_CH))
    out = jax.block_until_ready(fwd(kp, x, v))
    ref = jax.block_until_ready(reference_forward(raw, x, v))

    assert out.shape == (B, OUT_CH, H // 4, W // 4), out.shape
    # bf16 matmul operands with f32 accumulation -> relaxed tolerance vs f32 ref
    max_err = float(jnp.max(jnp.abs(out - ref)))
    assert jnp.allclose(out, ref, atol=2e-2, rtol=2e-2), max_err
    print("KERNEL_OK")
</pallas_src>

<mosaic_0001>
module attributes {stable_mosaic.version = 11 : i64} {
  func.func @_layer1_front_kernel(%arg0: i32, %arg1: memref<1x12x64xbf16, #tpu.memory_space<vmem>>, %arg2: memref<16x12xbf16, #tpu.memory_space<vmem>>, %arg3: memref<16x1xf32, #tpu.memory_space<vmem>>, %arg4: memref<9x32x16xbf16, #tpu.memory_space<vmem>>, %arg5: memref<32x1xf32, #tpu.memory_space<vmem>>, %arg6: memref<9x1x64xbf16, #tpu.memory_space<vmem>>, %arg7: memref<1x32x64xbf16, #tpu.memory_space<vmem>>, %arg8: memref<16x320xbf16, #tpu.memory_space<vmem>>) attributes {dimension_semantics = [#tpu.dimension_semantics<parallel>], iteration_bounds = array<i64: 2>, scalar_prefetch = 0 : i64, scratch_operands = 1 : i64, tpu.core_type = #tpu.core_type<tc>, window_params = [{transform_indices = @transform_0, window_bounds = array<i64: 1, 12, 64>}, {pipeline_mode = #tpu.pipeline_mode<synchronous>, transform_indices = @transform_1, window_bounds = array<i64: 16, 12>}, {pipeline_mode = #tpu.pipeline_mode<synchronous>, transform_indices = @transform_2, window_bounds = array<i64: 16, 1>}, {pipeline_mode = #tpu.pipeline_mode<synchronous>, transform_indices = @transform_3, window_bounds = array<i64: 9, 32, 16>}, {pipeline_mode = #tpu.pipeline_mode<synchronous>, transform_indices = @transform_4, window_bounds = array<i64: 32, 1>}, {pipeline_mode = #tpu.pipeline_mode<synchronous>, transform_indices = @transform_5, window_bounds = array<i64: 9, 1, 64>}, {transform_indices = @transform_6, window_bounds = array<i64: 1, 32, 64>}]} {
    %c0 = arith.constant 0 : index
    %c0_0 = arith.constant 0 : index
    %0 = vector.load %arg2[%c0, %c0_0] : memref<16x12xbf16, #tpu.memory_space<vmem>>, vector<16x12xbf16>
    %c0_1 = arith.constant 0 : index
    %c0_2 = arith.constant 0 : index
    %c0_3 = arith.constant 0 : index
    %1 = vector.load %arg1[%c0_1, %c0_2, %c0_3] : memref<1x12x64xbf16, #tpu.memory_space<vmem>>, vector<1x12x64xbf16>
    %2 = vector.shape_cast %1 : vector<1x12x64xbf16> to vector<12x64xbf16>
    %cst = arith.constant dense<0.000000e+00> : vector<16x64xf32>
    %3 = tpu.matmul %0, %2, %cst {dimension_numbers = #tpu.dot_dimension_numbers<[1], [0], [0], [1], [0, 0, 1, 1], [], []>} : vector<16x12xbf16>, vector<12x64xbf16>, vector<16x64xf32> -> vector<16x64xf32>
    %c0_4 = arith.constant 0 : index
    %c0_5 = arith.constant 0 : index
    %4 = vector.load %arg3[%c0_4, %c0_5] : memref<16x1xf32, #tpu.memory_space<vmem>>, vector<16x1xf32>
    %5 = vector.broadcast %4 : vector<16x1xf32> to vector<16x64xf32>
    %6 = arith.addf %3, %5 : vector<16x64xf32>
    %cst_6 = arith.constant 0.000000e+00 : f32
    %7 = vector.broadcast %cst_6 : f32 to vector<16x64xf32>
    %8 = arith.maximumf %6, %7 : vector<16x64xf32>
    %cst_7 = arith.constant 0.000000e+00 : bf16
    %9 = vector.broadcast %cst_7 : bf16 to vector<16x320xbf16>
    %c0_8 = arith.constant 0 : index
    %c0_9 = arith.constant 0 : index
    %10 = vector.load %arg8[%c0_8, %c0_9] : memref<16x320xbf16, #tpu.memory_space<vmem>>, vector<16x320xbf16>
    tpu.vector_store %arg8[%c0_8, %c0_9], %9 {strides = array<i32>} : memref<16x320xbf16, #tpu.memory_space<vmem>>, vector<16x320xbf16>,
    %11 = arith.truncf %8 : vector<16x64xf32> to vector<16x64xbf16>
    %c0_10 = arith.constant 0 : index
    %c128 = arith.constant 128 : index
    %12 = vector.load %arg8[%c0_10, %c128] : memref<16x320xbf16, #tpu.memory_space<vmem>>, vector<16x64xbf16>
    tpu.vector_store %arg8[%c0_10, %c128], %11 {strides = array<i32>} : memref<16x320xbf16, #tpu.memory_space<vmem>>, vector<16x64xbf16>,
    %cst_11 = arith.constant 0.000000e+00 : f32
    %13 = vector.broadcast %cst_11 : f32 to vector<32x64xf32>
    %c0_12 = arith.constant 0 : index
    %c119 = arith.constant 119 : index
    %14 = vector.load %arg8[%c0_12, %c119] : memref<16x320xbf16, #tpu.memory_space<vmem>>, vector<16x64xbf16>
    %c0_13 = arith.constant 0 : index
    %c0_14 = arith.constant 0 : index
    %c0_15 = arith.constant 0 : index
    %15 = vector.load %arg6[%c0_13, %c0_14, %c0_15] : memref<9x1x64xbf16, #tpu.memory_space<vmem>>, vector<1x1x64xbf16>
    %16 = vector.shape_cast %15 : vector<1x1x64xbf16> to vector<1x64xbf16>
    %c0_16 = arith.constant 0 : index
    %c0_17 = arith.constant 0 : index
    %c0_18 = arith.constant 0 : index
    %17 = vector.load %arg4[%c0_16, %c0_17, %c0_18] : memref<9x32x16xbf16, #tpu.memory_space<vmem>>, vector<1x32x16xbf16>
    %18 = vector.shape_cast %17 : vector<1x32x16xbf16> to vector<32x16xbf16>
    %19 = vector.broadcast %16 : vector<1x64xbf16> to vector<16x64xbf16>
    %20 = arith.mulf %14, %19 : vector<16x64xbf16>
    %cst_19 = arith.constant dense<0.000000e+00> : vector<32x64xf32>
    %21 = tpu.matmul %18, %20, %cst_19 {dimension_numbers = #tpu.dot_dimension_numbers<[1], [0], [0], [1], [0, 0, 1, 1], [], []>} : vector<32x16xbf16>, vector<16x64xbf16>, vector<32x64xf32> -> vector<32x64xf32>
    %22 = arith.addf %13, %21 : vector<32x64xf32>
    %c0_20 = arith.constant 0 : index
    %c120 = arith.constant 120 : index
    %23 = vector.load %arg8[%c0_20, %c120] : memref<16x320xbf16, #tpu.memory_space<vmem>>, vector<16x64xbf16>
    %c1 = arith.constant 1 : index
    %c0_21 = arith.constant 0 : index
    %c0_22 = arith.constant 0 : index
    %24 = vector.load %arg6[%c1, %c0_21, %c0_22] : memref<9x1x64xbf16, #tpu.memory_space<vmem>>, vector<1x1x64xbf16>
    %25 = vector.shape_cast %24 : vector<1x1x64xbf16> to vector<1x64xbf16>
    %c1_23 = arith.constant 1 : index
    %c0_24 = arith.constant 0 : index
    %c0_25 = arith.constant 0 : index
    %26 = vector.load %arg4[%c1_23, %c0_24, %c0_25] : memref<9x32x16xbf16, #tpu.memory_space<vmem>>, vector<1x32x16xbf16>
    %27 = vector.shape_cast %26 : vector<1x32x16xbf16> to vector<32x16xbf16>
    %28 = vector.broadcast %25 : vector<1x64xbf16> to vector<16x64xbf16>
    %29 = arith.mulf %23, %28 : vector<16x64xbf16>
    %cst_26 = arith.constant dense<0.000000e+00> : vector<32x64xf32>
    %30 = tpu.matmul %27, %29, %cst_26 {dimension_numbers = #tpu.dot_dimension_numbers<[1], [0], [0], [1], [0, 0, 1, 1], [], []>} : vector<32x16xbf16>, vector<16x64xbf16>, vector<32x64xf32> -> vector<32x64xf32>
    %31 = arith.addf %22, %30 : vector<32x64xf32>
    %c0_27 = arith.constant 0 : index
    %c121 = arith.constant 121 : index
    %32 = vector.load %arg8[%c0_27, %c121] : memref<16x320xbf16, #tpu.memory_space<vmem>>, vector<16x64xbf16>
    %c2 = arith.constant 2 : index
    %c0_28 = arith.constant 0 : index
    %c0_29 = arith.constant 0 : index
    %33 = vector.load %arg6[%c2, %c0_28, %c0_29] : memref<9x1x64xbf16, #tpu.memory_space<vmem>>, vector<1x1x64xbf16>
    %34 = vector.shape_cast %33 : vector<1x1x64xbf16> to vector<1x64xbf16>
    %c2_30 = arith.constant 2 : index
    %c0_31 = arith.constant 0 : index
    %c0_32 = arith.constant 0 : index
    %35 = vector.load %arg4[%c2_30, %c0_31, %c0_32] : memref<9x32x16xbf16, #tpu.memory_space<vmem>>, vector<1x32x16xbf16>
    %36 = vector.shape_cast %35 : vector<1x32x16xbf16> to vector<32x16xbf16>
    %37 = vector.broadcast %34 : vector<1x64xbf16> to vector<16x64xbf16>
    %38 = arith.mulf %32, %37 : vector<16x64xbf16>
    %cst_33 = arith.constant dense<0.000000e+00> : vector<32x64xf32>
    %39 = tpu.matmul %36, %38, %cst_33 {dimension_numbers = #tpu.dot_dimension_numbers<[1], [0], [0], [1], [0, 0, 1, 1], [], []>} : vector<32x16xbf16>, vector<16x64xbf16>, vector<32x64xf32> -> vector<32x64xf32>
    %40 = arith.addf %31, %39 : vector<32x64xf32>
    %c0_34 = arith.constant 0 : index
    %c127 = arith.constant 127 : index
    %41 = vector.load %arg8[%c0_34, %c127] : memref<16x320xbf16, #tpu.memory_space<vmem>>, vector<16x64xbf16>
    %c3 = arith.constant 3 : index
    %c0_35 = arith.constant 0 : index
    %c0_36 = arith.constant 0 : index
    %42 = vector.load %arg6[%c3, %c0_35, %c0_36] : memref<9x1x64xbf16, #tpu.memory_space<vmem>>, vector<1x1x64xbf16>
    %43 = vector.shape_cast %42 : vector<1x1x64xbf16> to vector<1x64xbf16>
    %c3_37 = arith.constant 3 : index
    %c0_38 = arith.constant 0 : index
    %c0_39 = arith.constant 0 : index
    %44 = vector.load %arg4[%c3_37, %c0_38, %c0_39] : memref<9x32x16xbf16, #tpu.memory_space<vmem>>, vector<1x32x16xbf16>
    %45 = vector.shape_cast %44 : vector<1x32x16xbf16> to vector<32x16xbf16>
    %46 = vector.broadcast %43 : vector<1x64xbf16> to vector<16x64xbf16>
    %47 = arith.mulf %41, %46 : vector<16x64xbf16>
    %cst_40 = arith.constant dense<0.000000e+00> : vector<32x64xf32>
    %48 = tpu.matmul %45, %47, %cst_40 {dimension_numbers = #tpu.dot_dimension_numbers<[1], [0], [0], [1], [0, 0, 1, 1], [], []>} : vector<32x16xbf16>, vector<16x64xbf16>, vector<32x64xf32> -> vector<32x64xf32>
    %49 = arith.addf %40, %48 : vector<32x64xf32>
    %c0_41 = arith.constant 0 : index
    %c128_42 = arith.constant 128 : index
    %50 = vector.load %arg8[%c0_41, %c128_42] : memref<16x320xbf16, #tpu.memory_space<vmem>>, vector<16x64xbf16>
    %c4 = arith.constant 4 : index
    %c0_43 = arith.constant 0 : index
    %c0_44 = arith.constant 0 : index
    %51 = vector.load %arg6[%c4, %c0_43, %c0_44] : memref<9x1x64xbf16, #tpu.memory_space<vmem>>, vector<1x1x64xbf16>
    %52 = vector.shape_cast %51 : vector<1x1x64xbf16> to vector<1x64xbf16>
    %c4_45 = arith.constant 4 : index
    %c0_46 = arith.constant 0 : index
    %c0_47 = arith.constant 0 : index
    %53 = vector.load %arg4[%c4_45, %c0_46, %c0_47] : memref<9x32x16xbf16, #tpu.memory_space<vmem>>, vector<1x32x16xbf16>
    %54 = vector.shape_cast %53 : vector<1x32x16xbf16> to vector<32x16xbf16>
    %55 = vector.broadcast %52 : vector<1x64xbf16> to vector<16x64xbf16>
    %56 = arith.mulf %50, %55 : vector<16x64xbf16>
    %cst_48 = arith.constant dense<0.000000e+00> : vector<32x64xf32>
    %57 = tpu.matmul %54, %56, %cst_48 {dimension_numbers = #tpu.dot_dimension_numbers<[1], [0], [0], [1], [0, 0, 1, 1], [], []>} : vector<32x16xbf16>, vector<16x64xbf16>, vector<32x64xf32> -> vector<32x64xf32>
    %58 = arith.addf %49, %57 : vector<32x64xf32>
    %c0_49 = arith.constant 0 : index
    %c129 = arith.constant 129 : index
    %59 = vector.load %arg8[%c0_49, %c129] : memref<16x320xbf16, #tpu.memory_space<vmem>>, vector<16x64xbf16>
    %c5 = arith.constant 5 : index
    %c0_50 = arith.constant 0 : index
    %c0_51 = arith.constant 0 : index
    %60 = vector.load %arg6[%c5, %c0_50, %c0_51] : memref<9x1x64xbf16, #tpu.memory_space<vmem>>, vector<1x1x64xbf16>
    %61 = vector.shape_cast %60 : vector<1x1x64xbf16> to vector<1x64xbf16>
    %c5_52 = arith.constant 5 : index
    %c0_53 = arith.constant 0 : index
    %c0_54 = arith.constant 0 : index
    %62 = vector.load %arg4[%c5_52, %c0_53, %c0_54] : memref<9x32x16xbf16, #tpu.memory_space<vmem>>, vector<1x32x16xbf16>
    %63 = vector.shape_cast %62 : vector<1x32x16xbf16> to vector<32x16xbf16>
    %64 = vector.broadcast %61 : vector<1x64xbf16> to vector<16x64xbf16>
    %65 = arith.mulf %59, %64 : vector<16x64xbf16>
    %cst_55 = arith.constant dense<0.000000e+00> : vector<32x64xf32>
    %66 = tpu.matmul %63, %65, %cst_55 {dimension_numbers = #tpu.dot_dimension_numbers<[1], [0], [0], [1], [0, 0, 1, 1], [], []>} : vector<32x16xbf16>, vector<16x64xbf16>, vector<32x64xf32> -> vector<32x64xf32>
    %67 = arith.addf %58, %66 : vector<32x64xf32>
    %c0_56 = arith.constant 0 : index
    %c135 = arith.constant 135 : index
    %68 = vector.load %arg8[%c0_56, %c135] : memref<16x320xbf16, #tpu.memory_space<vmem>>, vector<16x64xbf16>
    %c6 = arith.constant 6 : index
    %c0_57 = arith.constant 0 : index
    %c0_58 = arith.constant 0 : index
    %69 = vector.load %arg6[%c6, %c0_57, %c0_58] : memref<9x1x64xbf16, #tpu.memory_space<vmem>>, vector<1x1x64xbf16>
    %70 = vector.shape_cast %69 : vector<1x1x64xbf16> to vector<1x64xbf16>
    %c6_59 = arith.constant 6 : index
    %c0_60 = arith.constant 0 : index
    %c0_61 = arith.constant 0 : index
    %71 = vector.load %arg4[%c6_59, %c0_60, %c0_61] : memref<9x32x16xbf16, #tpu.memory_space<vmem>>, vector<1x32x16xbf16>
    %72 = vector.shape_cast %71 : vector<1x32x16xbf16> to vector<32x16xbf16>
    %73 = vector.broadcast %70 : vector<1x64xbf16> to vector<16x64xbf16>
    %74 = arith.mulf %68, %73 : vector<16x64xbf16>
    %cst_62 = arith.constant dense<0.000000e+00> : vector<32x64xf32>
    %75 = tpu.matmul %72, %74, %cst_62 {dimension_numbers = #tpu.dot_dimension_numbers<[1], [0], [0], [1], [0, 0, 1, 1], [], []>} : vector<32x16xbf16>, vector<16x64xbf16>, vector<32x64xf32> -> vector<32x64xf32>
    %76 = arith.addf %67, %75 : vector<32x64xf32>
    %c0_63 = arith.constant 0 : index
    %c136 = arith.constant 136 : index
    %77 = vector.load %arg8[%c0_63, %c136] : memref<16x320xbf16, #tpu.memory_space<vmem>>, vector<16x64xbf16>
    %c7 = arith.constant 7 : index
    %c0_64 = arith.constant 0 : index
    %c0_65 = arith.constant 0 : index
    %78 = vector.load %arg6[%c7, %c0_64, %c0_65] : memref<9x1x64xbf16, #tpu.memory_space<vmem>>, vector<1x1x64xbf16>
    %79 = vector.shape_cast %78 : vector<1x1x64xbf16> to vector<1x64xbf16>
    %c7_66 = arith.constant 7 : index
    %c0_67 = arith.constant 0 : index
    %c0_68 = arith.constant 0 : index
    %80 = vector.load %arg4[%c7_66, %c0_67, %c0_68] : memref<9x32x16xbf16, #tpu.memory_space<vmem>>, vector<1x32x16xbf16>
    %81 = vector.shape_cast %80 : vector<1x32x16xbf16> to vector<32x16xbf16>
    %82 = vector.broadcast %79 : vector<1x64xbf16> to vector<16x64xbf16>
    %83 = arith.mulf %77, %82 : vector<16x64xbf16>
    %cst_69 = arith.constant dense<0.000000e+00> : vector<32x64xf32>
    %84 = tpu.matmul %81, %83, %cst_69 {dimension_numbers = #tpu.dot_dimension_numbers<[1], [0], [0], [1], [0, 0, 1, 1], [], []>} : vector<32x16xbf16>, vector<16x64xbf16>, vector<32x64xf32> -> vector<32x64xf32>
    %85 = arith.addf %76, %84 : vector<32x64xf32>
    %c0_70 = arith.constant 0 : index
    %c137 = arith.constant 137 : index
    %86 = vector.load %arg8[%c0_70, %c137] : memref<16x320xbf16, #tpu.memory_space<vmem>>, vector<16x64xbf16>
    %c8 = arith.constant 8 : index
    %c0_71 = arith.constant 0 : index
    %c0_72 = arith.constant 0 : index
    %87 = vector.load %arg6[%c8, %c0_71, %c0_72] : memref<9x1x64xbf16, #tpu.memory_space<vmem>>, vector<1x1x64xbf16>
    %88 = vector.shape_cast %87 : vector<1x1x64xbf16> to vector<1x64xbf16>
    %c8_73 = arith.constant 8 : index
    %c0_74 = arith.constant 0 : index
    %c0_75 = arith.constant 0 : index
    %89 = vector.load %arg4[%c8_73, %c0_74, %c0_75] : memref<9x32x16xbf16, #tpu.memory_space<vmem>>, vector<1x32x16xbf16>
    %90 = vector.shape_cast %89 : vector<1x32x16xbf16> to vector<32x16xbf16>
    %91 = vector.broadcast %88 : vector<1x64xbf16> to vector<16x64xbf16>
    %92 = arith.mulf %86, %91 : vector<16x64xbf16>
    %cst_76 = arith.constant dense<0.000000e+00> : vector<32x64xf32>
    %93 = tpu.matmul %90, %92, %cst_76 {dimension_numbers = #tpu.dot_dimension_numbers<[1], [0], [0], [1], [0, 0, 1, 1], [], []>} : vector<32x16xbf16>, vector<16x64xbf16>, vector<32x64xf32> -> vector<32x64xf32>
    %94 = arith.addf %85, %93 : vector<32x64xf32>
    %c0_77 = arith.constant 0 : index
    %c0_78 = arith.constant 0 : index
    %95 = vector.load %arg5[%c0_77, %c0_78] : memref<32x1xf32, #tpu.memory_space<vmem>>, vector<32x1xf32>
    %96 = vector.broadcast %95 : vector<32x1xf32> to vector<32x64xf32>
    %97 = arith.addf %94, %96 : vector<32x64xf32>
    %cst_79 = arith.constant 0.000000e+00 : f32
    %98 = vector.broadcast %cst_79 : f32 to vector<32x64xf32>
    %99 = arith.maximumf %97, %98 : vector<32x64xf32>
    %100 = arith.truncf %99 : vector<32x64xf32> to vector<32x64xbf16>
    %c0_80 = arith.constant 0 : index
    %c0_81 = arith.constant 0 : index
    %c0_82 = arith.constant 0 : index
    %101 = vector.load %arg7[%c0_80, %c0_81, %c0_82] : memref<1x32x64xbf16, #tpu.memory_space<vmem>>, vector<1x32x64xbf16>
    %102 = vector.shape_cast %101 : vector<1x32x64xbf16> to vector<32x64xbf16>
    %103 = vector.shape_cast %100 : vector<32x64xbf16> to vector<1x32x64xbf16>
    tpu.vector_store %arg7[%c0_80, %c0_81, %c0_82], %103 {strides = array<i32>} : memref<1x32x64xbf16, #tpu.memory_space<vmem>>, vector<1x32x64xbf16>,
    return
  }
  func.func @transform_0(%arg0: i32) -> (i32, i32, i32) {
    %c0_i32 = arith.constant 0 : i32
    %c0_i32_0 = arith.constant 0 : i32
    %c0_i32_1 = arith.constant 0 : i32
    return %arg0, %c0_i32, %c0_i32_0 : i32, i32, i32
  }
  func.func @transform_1(%arg0: i32) -> (i32, i32) {
    %c0_i32 = arith.constant 0 : i32
    %c0_i32_0 = arith.constant 0 : i32
    %c0_i32_1 = arith.constant 0 : i32
    return %c0_i32, %c0_i32_0 : i32, i32
  }
  func.func @transform_2(%arg0: i32) -> (i32, i32) {
    %c0_i32 = arith.constant 0 : i32
    %c0_i32_0 = arith.constant 0 : i32
    %c0_i32_1 = arith.constant 0 : i32
    return %c0_i32, %c0_i32_0 : i32, i32
  }
  func.func @transform_3(%arg0: i32) -> (i32, i32, i32) {
    %c0_i32 = arith.constant 0 : i32
    %c0_i32_0 = arith.constant 0 : i32
    %c0_i32_1 = arith.constant 0 : i32
    %c0_i32_2 = arith.constant 0 : i32
    return %c0_i32, %c0_i32_0, %c0_i32_1 : i32, i32, i32
  }
  func.func @transform_4(%arg0: i32) -> (i32, i32) {
    %c0_i32 = arith.constant 0 : i32
    %c0_i32_0 = arith.constant 0 : i32
    %c0_i32_1 = arith.constant 0 : i32
    return %c0_i32, %c0_i32_0 : i32, i32
  }
  func.func @transform_5(%arg0: i32) -> (i32, i32, i32) {
    %c0_i32 = arith.constant 0 : i32
    %c0_i32_0 = arith.constant 0 : i32
    %c0_i32_1 = arith.constant 0 : i32
    %c0_i32_2 = arith.constant 0 : i32
    return %c0_i32, %c0_i32_0, %c0_i32_1 : i32, i32, i32
  }
  func.func @transform_6(%arg0: i32) -> (i32, i32, i32) {
    %c0_i32 = arith.constant 0 : i32
    %c0_i32_0 = arith.constant 0 : i32
    %c0_i32_1 = arith.constant 0 : i32
    return %arg0, %c0_i32, %c0_i32_0 : i32, i32, i32
  }
}

module attributes {stable_mosaic.version = 11 : i64} {
  func.func @_layer2_kernel(%arg0: i32, %arg1: memref<1x128x16xbf16, #tpu.memory_space<vmem>>, %arg2: memref<16x128xbf16, #tpu.memory_space<vmem>>, %arg3: memref<16x1xf32, #tpu.memory_space<vmem>>, %arg4: memref<9x32x16xbf16, #tpu.memory_space<vmem>>, %arg5: memref<32x1xf32, #tpu.memory_space<vmem>>, %arg6: memref<1x9x32x1xf32, #tpu.memory_space<vmem>>, %arg7: memref<9x16x32xbf16, #tpu.memory_space<vmem>>, %arg8: memref<16x1xf32, #tpu.memory_space<vmem>>, %arg9: memref<16x16xbf16, #tpu.memory_space<vmem>>, %arg10: memref<16x1xf32, #tpu.memory_space<vmem>>, %arg11: memref<9x1x16xbf16, #tpu.memory_space<vmem>>, %arg12: memref<1x16x16xf32, #tpu.memory_space<vmem>>, %arg13: memref<16x272xbf16, #tpu.memory_space<vmem>>, %arg14: memref<32x272xbf16, #tpu.memory_space<vmem>>) attributes {dimension_semantics = [#tpu.dimension_semantics<parallel>], iteration_bounds = array<i64: 2>, scalar_prefetch = 0 : i64, scratch_operands = 2 : i64, tpu.core_type = #tpu.core_type<tc>, window_params = [{transform_indices = @transform_0, window_bounds = array<i64: 1, 128, 16>}, {pipeline_mode = #tpu.pipeline_mode<synchronous>, transform_indices = @transform_1, window_bounds = array<i64: 16, 128>}, {pipeline_mode = #tpu.pipeline_mode<synchronous>, transform_indices = @transform_2, window_bounds = array<i64: 16, 1>}, {pipeline_mode = #tpu.pipeline_mode<synchronous>, transform_indices = @transform_3, window_bounds = array<i64: 9, 32, 16>}, {pipeline_mode = #tpu.pipeline_mode<synchronous>, transform_indices = @transform_4, window_bounds = array<i64: 32, 1>}, {transform_indices = @transform_5, window_bounds = array<i64: 1, 9, 32, 1>}, {pipeline_mode = #tpu.pipeline_mode<synchronous>, transform_indices = @transform_6, window_bounds = array<i64: 9, 16, 32>}, {pipeline_mode = #tpu.pipeline_mode<synchronous>, transform_indices = @transform_7, window_bounds = array<i64: 16, 1>}, {pipeline_mode = #tpu.pipeline_mode<synchronous>, transform_indices = @transform_8, window_bounds = array<i64: 16, 16>}, {pipeline_mode = #tpu.pipeline_mode<synchronous>, transform_indices = @transform_9, window_bounds = array<i64: 16, 1>}, {pipeline_mode = #tpu.pipeline_mode<synchronous>, transform_indices = @transform_10, window_bounds = array<i64: 9, 1, 16>}, {transform_indices = @transform_11, window_bounds = array<i64: 1, 16, 16>}]} {
    %c0 = arith.constant 0 : index
    %c0_0 = arith.constant 0 : index
    %0 = vector.load %arg2[%c0, %c0_0] : memref<16x128xbf16, #tpu.memory_space<vmem>>, vector<16x128xbf16>
    %c0_1 = arith.constant 0 : index
    %c0_2 = arith.constant 0 : index
    %c0_3 = arith.constant 0 : index
    %1 = vector.load %arg1[%c0_1, %c0_2, %c0_3] : memref<1x128x16xbf16, #tpu.memory_space<vmem>>, vector<1x128x16xbf16>
    %2 = vector.shape_cast %1 : vector<1x128x16xbf16> to vector<128x16xbf16>
    %cst = arith.constant dense<0.000000e+00> : vector<16x16xf32>
    %3 = tpu.matmul %0, %2, %cst {dimension_numbers = #tpu.dot_dimension_numbers<[1], [0], [0], [1], [0, 0, 1, 1], [], []>} : vector<16x128xbf16>, vector<128x16xbf16>, vector<16x16xf32> -> vector<16x16xf32>
    %c0_4 = arith.constant 0 : index
    %c0_5 = arith.constant 0 : index
    %4 = vector.load %arg3[%c0_4, %c0_5] : memref<16x1xf32, #tpu.memory_space<vmem>>, vector<16x1xf32>
    %5 = vector.broadcast %4 : vector<16x1xf32> to vector<16x16xf32>
    %6 = arith.addf %3, %5 : vector<16x16xf32>
    %cst_6 = arith.constant 0.000000e+00 : bf16
    %7 = vector.broadcast %cst_6 : bf16 to vector<16x272xbf16>
    %c0_7 = arith.constant 0 : index
    %c0_8 = arith.constant 0 : index
    %8 = vector.load %arg13[%c0_7, %c0_8] : memref<16x272xbf16, #tpu.memory_space<vmem>>, vector<16x272xbf16>
    tpu.vector_store %arg13[%c0_7, %c0_8], %7 {strides = array<i32>} : memref<16x272xbf16, #tpu.memory_space<vmem>>, vector<16x272xbf16>,
    %9 = arith.truncf %6 : vector<16x16xf32> to vector<16x16xbf16>
    %c0_9 = arith.constant 0 : index
    %c128 = arith.constant 128 : index
    %10 = vector.load %arg13[%c0_9, %c128] : memref<16x272xbf16, #tpu.memory_space<vmem>>, vector<16x16xbf16>
    tpu.vector_store %arg13[%c0_9, %c128], %9 {strides = array<i32>} : memref<16x272xbf16, #tpu.memory_space<vmem>>, vector<16x16xbf16>,
    %cst_10 = arith.constant 0.000000e+00 : f32
    %11 = vector.broadcast %cst_10 : f32 to vector<32x16xf32>
    %c0_11 = arith.constant 0 : index
    %c123 = arith.constant 123 : index
    %12 = vector.load %arg13[%c0_11, %c123] : memref<16x272xbf16, #tpu.memory_space<vmem>>, vector<16x16xbf16>
    %c0_12 = arith.constant 0 : index
    %c0_13 = arith.constant 0 : index
    %c0_14 = arith.constant 0 : index
    %13 = vector.load %arg11[%c0_12, %c0_13, %c0_14] : memref<9x1x16xbf16, #tpu.memory_space<vmem>>, vector<1x1x16xbf16>
    %14 = vector.shape_cast %13 : vector<1x1x16xbf16> to vector<1x16xbf16>
    %c0_15 = arith.constant 0 : index
    %c0_16 = arith.constant 0 : index
    %c0_17 = arith.constant 0 : index
    %15 = vector.load %arg4[%c0_15, %c0_16, %c0_17] : memref<9x32x16xbf16, #tpu.memory_space<vmem>>, vector<1x32x16xbf16>
    %16 = vector.shape_cast %15 : vector<1x32x16xbf16> to vector<32x16xbf16>
    %17 = vector.broadcast %14 : vector<1x16xbf16> to vector<16x16xbf16>
    %18 = arith.mulf %12, %17 : vector<16x16xbf16>
    %cst_18 = arith.constant dense<0.000000e+00> : vector<32x16xf32>
    %19 = tpu.matmul %16, %18, %cst_18 {dimension_numbers = #tpu.dot_dimension_numbers<[1], [0], [0], [1], [0, 0, 1, 1], [], []>} : vector<32x16xbf16>, vector<16x16xbf16>, vector<32x16xf32> -> vector<32x16xf32>
    %20 = arith.addf %11, %19 : vector<32x16xf32>
    %c0_19 = arith.constant 0 : index
    %c0_20 = arith.constant 0 : index
    %c0_21 = arith.constant 0 : index
    %c0_22 = arith.constant 0 : index
    %21 = vector.load %arg6[%c0_19, %c0_20, %c0_21, %c0_22] : memref<1x9x32x1xf32, #tpu.memory_space<vmem>>, vector<1x1x32x1xf32>
    %22 = vector.shape_cast %21 : vector<1x1x32x1xf32> to vector<32x1xf32>
    %23 = arith.extf %14 : vector<1x16xbf16> to vector<1x16xf32>
    %24 = vector.broadcast %22 : vector<32x1xf32> to vector<32x16xf32>
    %25 = vector.broadcast %23 : vector<1x16xf32> to vector<32x16xf32>
    %26 = arith.mulf %24, %25 : vector<32x16xf32>
    %27 = arith.addf %20, %26 : vector<32x16xf32>
    %c0_23 = arith.constant 0 : index
    %c124 = arith.constant 124 : index
    %28 = vector.load %arg13[%c0_23, %c124] : memref<16x272xbf16, #tpu.memory_space<vmem>>, vector<16x16xbf16>
    %c1 = arith.constant 1 : index
    %c0_24 = arith.constant 0 : index
    %c0_25 = arith.constant 0 : index
    %29 = vector.load %arg11[%c1, %c0_24, %c0_25] : memref<9x1x16xbf16, #tpu.memory_space<vmem>>, vector<1x1x16xbf16>
    %30 = vector.shape_cast %29 : vector<1x1x16xbf16> to vector<1x16xbf16>
    %c1_26 = arith.constant 1 : index
    %c0_27 = arith.constant 0 : index
    %c0_28 = arith.constant 0 : index
    %31 = vector.load %arg4[%c1_26, %c0_27, %c0_28] : memref<9x32x16xbf16, #tpu.memory_space<vmem>>, vector<1x32x16xbf16>
    %32 = vector.shape_cast %31 : vector<1x32x16xbf16> to vector<32x16xbf16>
    %33 = vector.broadcast %30 : vector<1x16xbf16> to vector<16x16xbf16>
    %34 = arith.mulf %28, %33 : vector<16x16xbf16>
    %cst_29 = arith.constant dense<0.000000e+00> : vector<32x16xf32>
    %35 = tpu.matmul %32, %34, %cst_29 {dimension_numbers = #tpu.dot_dimension_numbers<[1], [0], [0], [1], [0, 0, 1, 1], [], []>} : vector<32x16xbf16>, vector<16x16xbf16>, vector<32x16xf32> -> vector<32x16xf32>
    %36 = arith.addf %27, %35 : vector<32x16xf32>
    %c0_30 = arith.constant 0 : index
    %c1_31 = arith.constant 1 : index
    %c0_32 = arith.constant 0 : index
    %c0_33 = arith.constant 0 : index
    %37 = vector.load %arg6[%c0_30, %c1_31, %c0_32, %c0_33] : memref<1x9x32x1xf32, #tpu.memory_space<vmem>>, vector<1x1x32x1xf32>
    %38 = vector.shape_cast %37 : vector<1x1x32x1xf32> to vector<32x1xf32>
    %39 = arith.extf %30 : vector<1x16xbf16> to vector<1x16xf32>
    %40 = vector.broadcast %38 : vector<32x1xf32> to vector<32x16xf32>
    %41 = vector.broadcast %39 : vector<1x16xf32> to vector<32x16xf32>
    %42 = arith.mulf %40, %41 : vector<32x16xf32>
    %43 = arith.addf %36, %42 : vector<32x16xf32>
    %c0_34 = arith.constant 0 : index
    %c125 = arith.constant 125 : index
    %44 = vector.load %arg13[%c0_34, %c125] : memref<16x272xbf16, #tpu.memory_space<vmem>>, vector<16x16xbf16>
    %c2 = arith.constant 2 : index
    %c0_35 = arith.constant 0 : index
    %c0_36 = arith.constant 0 : index
    %45 = vector.load %arg11[%c2, %c0_35, %c0_36] : memref<9x1x16xbf16, #tpu.memory_space<vmem>>, vector<1x1x16xbf16>
    %46 = vector.shape_cast %45 : vector<1x1x16xbf16> to vector<1x16xbf16>
    %c2_37 = arith.constant 2 : index
    %c0_38 = arith.constant 0 : index
    %c0_39 = arith.constant 0 : index
    %47 = vector.load %arg4[%c2_37, %c0_38, %c0_39] : memref<9x32x16xbf16, #tpu.memory_space<vmem>>, vector<1x32x16xbf16>
    %48 = vector.shape_cast %47 : vector<1x32x16xbf16> to vector<32x16xbf16>
    %49 = vector.broadcast %46 : vector<1x16xbf16> to vector<16x16xbf16>
    %50 = arith.mulf %44, %49 : vector<16x16xbf16>
    %cst_40 = arith.constant dense<0.000000e+00> : vector<32x16xf32>
    %51 = tpu.matmul %48, %50, %cst_40 {dimension_numbers = #tpu.dot_dimension_numbers<[1], [0], [0], [1], [0, 0, 1, 1], [], []>} : vector<32x16xbf16>, vector<16x16xbf16>, vector<32x16xf32> -> vector<32x16xf32>
    %52 = arith.addf %43, %51 : vector<32x16xf32>
    %c0_41 = arith.constant 0 : index
    %c2_42 = arith.constant 2 : index
    %c0_43 = arith.constant 0 : index
    %c0_44 = arith.constant 0 : index
    %53 = vector.load %arg6[%c0_41, %c2_42, %c0_43, %c0_44] : memref<1x9x32x1xf32, #tpu.memory_space<vmem>>, vector<1x1x32x1xf32>
    %54 = vector.shape_cast %53 : vector<1x1x32x1xf32> to vector<32x1xf32>
    %55 = arith.extf %46 : vector<1x16xbf16> to vector<1x16xf32>
    %56 = vector.broadcast %54 : vector<32x1xf32> to vector<32x16xf32>
    %57 = vector.broadcast %55 : vector<1x16xf32> to vector<32x16xf32>
    %58 = arith.mulf %56, %57 : vector<32x16xf32>
    %59 = arith.addf %52, %58 : vector<32x16xf32>
    %c0_45 = arith.constant 0 : index
    %c127 = arith.constant 127 : index
    %60 = vector.load %arg13[%c0_45, %c127] : memref<16x272xbf16, #tpu.memory_space<vmem>>, vector<16x16xbf16>
    %c3 = arith.constant 3 : index
    %c0_46 = arith.constant 0 : index
    %c0_47 = arith.constant 0 : index
    %61 = vector.load %arg11[%c3, %c0_46, %c0_47] : memref<9x1x16xbf16, #tpu.memory_space<vmem>>, vector<1x1x16xbf16>
    %62 = vector.shape_cast %61 : vector<1x1x16xbf16> to vector<1x16xbf16>
    %c3_48 = arith.constant 3 : index
    %c0_49 = arith.constant 0 : index
    %c0_50 = arith.constant 0 : index
    %63 = vector.load %arg4[%c3_48, %c0_49, %c0_50] : memref<9x32x16xbf16, #tpu.memory_space<vmem>>, vector<1x32x16xbf16>
    %64 = vector.shape_cast %63 : vector<1x32x16xbf16> to vector<32x16xbf16>
    %65 = vector.broadcast %62 : vector<1x16xbf16> to vector<16x16xbf16>
    %66 = arith.mulf %60, %65 : vector<16x16xbf16>
    %cst_51 = arith.constant dense<0.000000e+00> : vector<32x16xf32>
    %67 = tpu.matmul %64, %66, %cst_51 {dimension_numbers = #tpu.dot_dimension_numbers<[1], [0], [0], [1], [0, 0, 1, 1], [], []>} : vector<32x16xbf16>, vector<16x16xbf16>, vector<32x16xf32> -> vector<32x16xf32>
    %68 = arith.addf %59, %67 : vector<32x16xf32>
    %c0_52 = arith.constant 0 : index
    %c3_53 = arith.constant 3 : index
    %c0_54 = arith.constant 0 : index
    %c0_55 = arith.constant 0 : index
    %69 = vector.load %arg6[%c0_52, %c3_53, %c0_54, %c0_55] : memref<1x9x32x1xf32, #tpu.memory_space<vmem>>, vector<1x1x32x1xf32>
    %70 = vector.shape_cast %69 : vector<1x1x32x1xf32> to vector<32x1xf32>
    %71 = arith.extf %62 : vector<1x16xbf16> to vector<1x16xf32>
    %72 = vector.broadcast %70 : vector<32x1xf32> to vector<32x16xf32>
    %73 = vector.broadcast %71 : vector<1x16xf32> to vector<32x16xf32>
    %74 = arith.mulf %72, %73 : vector<32x16xf32>
    %75 = arith.addf %68, %74 : vector<32x16xf32>
    %c0_56 = arith.constant 0 : index
    %c128_57 = arith.constant 128 : index
    %76 = vector.load %arg13[%c0_56, %c128_57] : memref<16x272xbf16, #tpu.memory_space<vmem>>, vector<16x16xbf16>
    %c4 = arith.constant 4 : index
    %c0_58 = arith.constant 0 : index
    %c0_59 = arith.constant 0 : index
    %77 = vector.load %arg11[%c4, %c0_58, %c0_59] : memref<9x1x16xbf16, #tpu.memory_space<vmem>>, vector<1x1x16xbf16>
    %78 = vector.shape_cast %77 : vector<1x1x16xbf16> to vector<1x16xbf16>
    %c4_60 = arith.constant 4 : index
    %c0_61 = arith.constant 0 : index
    %c0_62 = arith.constant 0 : index
    %79 = vector.load %arg4[%c4_60, %c0_61, %c0_62] : memref<9x32x16xbf16, #tpu.memory_space<vmem>>, vector<1x32x16xbf16>
    %80 = vector.shape_cast %79 : vector<1x32x16xbf16> to vector<32x16xbf16>
    %81 = vector.broadcast %78 : vector<1x16xbf16> to vector<16x16xbf16>
    %82 = arith.mulf %76, %81 : vector<16x16xbf16>
    %cst_63 = arith.constant dense<0.000000e+00> : vector<32x16xf32>
    %83 = tpu.matmul %80, %82, %cst_63 {dimension_numbers = #tpu.dot_dimension_numbers<[1], [0], [0], [1], [0, 0, 1, 1], [], []>} : vector<32x16xbf16>, vector<16x16xbf16>, vector<32x16xf32> -> vector<32x16xf32>
    %84 = arith.addf %75, %83 : vector<32x16xf32>
    %c0_64 = arith.constant 0 : index
    %c4_65 = arith.constant 4 : index
    %c0_66 = arith.constant 0 : index
    %c0_67 = arith.constant 0 : index
    %85 = vector.load %arg6[%c0_64, %c4_65, %c0_66, %c0_67] : memref<1x9x32x1xf32, #tpu.memory_space<vmem>>, vector<1x1x32x1xf32>
    %86 = vector.shape_cast %85 : vector<1x1x32x1xf32> to vector<32x1xf32>
    %87 = arith.extf %78 : vector<1x16xbf16> to vector<1x16xf32>
    %88 = vector.broadcast %86 : vector<32x1xf32> to vector<32x16xf32>
    %89 = vector.broadcast %87 : vector<1x16xf32> to vector<32x16xf32>
    %90 = arith.mulf %88, %89 : vector<32x16xf32>
    %91 = arith.addf %84, %90 : vector<32x16xf32>
    %c0_68 = arith.constant 0 : index
    %c129 = arith.constant 129 : index
    %92 = vector.load %arg13[%c0_68, %c129] : memref<16x272xbf16, #tpu.memory_space<vmem>>, vector<16x16xbf16>
    %c5 = arith.constant 5 : index
    %c0_69 = arith.constant 0 : index
    %c0_70 = arith.constant 0 : index
    %93 = vector.load %arg11[%c5, %c0_69, %c0_70] : memref<9x1x16xbf16, #tpu.memory_space<vmem>>, vector<1x1x16xbf16>
    %94 = vector.shape_cast %93 : vector<1x1x16xbf16> to vector<1x16xbf16>
    %c5_71 = arith.constant 5 : index
    %c0_72 = arith.constant 0 : index
    %c0_73 = arith.constant 0 : index
    %95 = vector.load %arg4[%c5_71, %c0_72, %c0_73] : memref<9x32x16xbf16, #tpu.memory_space<vmem>>, vector<1x32x16xbf16>
    %96 = vector.shape_cast %95 : vector<1x32x16xbf16> to vector<32x16xbf16>
    %97 = vector.broadcast %94 : vector<1x16xbf16> to vector<16x16xbf16>
    %98 = arith.mulf %92, %97 : vector<16x16xbf16>
    %cst_74 = arith.constant dense<0.000000e+00> : vector<32x16xf32>
    %99 = tpu.matmul %96, %98, %cst_74 {dimension_numbers = #tpu.dot_dimension_numbers<[1], [0], [0], [1], [0, 0, 1, 1], [], []>} : vector<32x16xbf16>, vector<16x16xbf16>, vector<32x16xf32> -> vector<32x16xf32>
    %100 = arith.addf %91, %99 : vector<32x16xf32>
    %c0_75 = arith.constant 0 : index
    %c5_76 = arith.constant 5 : index
    %c0_77 = arith.constant 0 : index
    %c0_78 = arith.constant 0 : index
    %101 = vector.load %arg6[%c0_75, %c5_76, %c0_77, %c0_78] : memref<1x9x32x1xf32, #tpu.memory_space<vmem>>, vector<1x1x32x1xf32>
    %102 = vector.shape_cast %101 : vector<1x1x32x1xf32> to vector<32x1xf32>
    %103 = arith.extf %94 : vector<1x16xbf16> to vector<1x16xf32>
    %104 = vector.broadcast %102 : vector<32x1xf32> to vector<32x16xf32>
    %105 = vector.broadcast %103 : vector<1x16xf32> to vector<32x16xf32>
    %106 = arith.mulf %104, %105 : vector<32x16xf32>
    %107 = arith.addf %100, %106 : vector<32x16xf32>
    %c0_79 = arith.constant 0 : index
    %c131 = arith.constant 131 : index
    %108 = vector.load %arg13[%c0_79, %c131] : memref<16x272xbf16, #tpu.memory_space<vmem>>, vector<16x16xbf16>
    %c6 = arith.constant 6 : index
    %c0_80 = arith.constant 0 : index
    %c0_81 = arith.constant 0 : index
    %109 = vector.load %arg11[%c6, %c0_80, %c0_81] : memref<9x1x16xbf16, #tpu.memory_space<vmem>>, vector<1x1x16xbf16>
    %110 = vector.shape_cast %109 : vector<1x1x16xbf16> to vector<1x16xbf16>
    %c6_82 = arith.constant 6 : index
    %c0_83 = arith.constant 0 : index
    %c0_84 = arith.constant 0 : index
    %111 = vector.load %arg4[%c6_82, %c0_83, %c0_84] : memref<9x32x16xbf16, #tpu.memory_space<vmem>>, vector<1x32x16xbf16>
    %112 = vector.shape_cast %111 : vector<1x32x16xbf16> to vector<32x16xbf16>
    %113 = vector.broadcast %110 : vector<1x16xbf16> to vector<16x16xbf16>
    %114 = arith.mulf %108, %113 : vector<16x16xbf16>
    %cst_85 = arith.constant dense<0.000000e+00> : vector<32x16xf32>
    %115 = tpu.matmul %112, %114, %cst_85 {dimension_numbers = #tpu.dot_dimension_numbers<[1], [0], [0], [1], [0, 0, 1, 1], [], []>} : vector<32x16xbf16>, vector<16x16xbf16>, vector<32x16xf32> -> vector<32x16xf32>
    %116 = arith.addf %107, %115 : vector<32x16xf32>
    %c0_86 = arith.constant 0 : index
    %c6_87 = arith.constant 6 : index
    %c0_88 = arith.constant 0 : index
    %c0_89 = arith.constant 0 : index
    %117 = vector.load %arg6[%c0_86, %c6_87, %c0_88, %c0_89] : memref<1x9x32x1xf32, #tpu.memory_space<vmem>>, vector<1x1x32x1xf32>
    %118 = vector.shape_cast %117 : vector<1x1x32x1xf32> to vector<32x1xf32>
    %119 = arith.extf %110 : vector<1x16xbf16> to vector<1x16xf32>
    %120 = vector.broadcast %118 : vector<32x1xf32> to vector<32x16xf32>
    %121 = vector.broadcast %119 : vector<1x16xf32> to vector<32x16xf32>
    %122 = arith.mulf %120, %121 : vector<32x16xf32>
    %123 = arith.addf %116, %122 : vector<32x16xf32>
    %c0_90 = arith.constant 0 : index
    %c132 = arith.constant 132 : index
    %124 = vector.load %arg13[%c0_90, %c132] : memref<16x272xbf16, #tpu.memory_space<vmem>>, vector<16x16xbf16>
    %c7 = arith.constant 7 : index
    %c0_91 = arith.constant 0 : index
    %c0_92 = arith.constant 0 : index
    %125 = vector.load %arg11[%c7, %c0_91, %c0_92] : memref<9x1x16xbf16, #tpu.memory_space<vmem>>, vector<1x1x16xbf16>
    %126 = vector.shape_cast %125 : vector<1x1x16xbf16> to vector<1x16xbf16>
    %c7_93 = arith.constant 7 : index
    %c0_94 = arith.constant 0 : index
    %c0_95 = arith.constant 0 : index
    %127 = vector.load %arg4[%c7_93, %c0_94, %c0_95] : memref<9x32x16xbf16, #tpu.memory_space<vmem>>, vector<1x32x16xbf16>
    %128 = vector.shape_cast %127 : vector<1x32x16xbf16> to vector<32x16xbf16>
    %129 = vector.broadcast %126 : vector<1x16xbf16> to vector<16x16xbf16>
    %130 = arith.mulf %124, %129 : vector<16x16xbf16>
    %cst_96 = arith.constant dense<0.000000e+00> : vector<32x16xf32>
    %131 = tpu.matmul %128, %130, %cst_96 {dimension_numbers = #tpu.dot_dimension_numbers<[1], [0], [0], [1], [0, 0, 1, 1], [], []>} : vector<32x16xbf16>, vector<16x16xbf16>, vector<32x16xf32> -> vector<32x16xf32>
    %132 = arith.addf %123, %131 : vector<32x16xf32>
    %c0_97 = arith.constant 0 : index
    %c7_98 = arith.constant 7 : index
    %c0_99 = arith.constant 0 : index
    %c0_100 = arith.constant 0 : index
    %133 = vector.load %arg6[%c0_97, %c7_98, %c0_99, %c0_100] : memref<1x9x32x1xf32, #tpu.memory_space<vmem>>, vector<1x1x32x1xf32>
    %134 = vector.shape_cast %133 : vector<1x1x32x1xf32> to vector<32x1xf32>
    %135 = arith.extf %126 : vector<1x16xbf16> to vector<1x16xf32>
    %136 = vector.broadcast %134 : vector<32x1xf32> to vector<32x16xf32>
    %137 = vector.broadcast %135 : vector<1x16xf32> to vector<32x16xf32>
    %138 = arith.mulf %136, %137 : vector<32x16xf32>
    %139 = arith.addf %132, %138 : vector<32x16xf32>
    %c0_101 = arith.constant 0 : index
    %c133 = arith.constant 133 : index
    %140 = vector.load %arg13[%c0_101, %c133] : memref<16x272xbf16, #tpu.memory_space<vmem>>, vector<16x16xbf16>
    %c8 = arith.constant 8 : index
    %c0_102 = arith.constant 0 : index
    %c0_103 = arith.constant 0 : index
    %141 = vector.load %arg11[%c8, %c0_102, %c0_103] : memref<9x1x16xbf16, #tpu.memory_space<vmem>>, vector<1x1x16xbf16>
    %142 = vector.shape_cast %141 : vector<1x1x16xbf16> to vector<1x16xbf16>
    %c8_104 = arith.constant 8 : index
    %c0_105 = arith.constant 0 : index
    %c0_106 = arith.constant 0 : index
    %143 = vector.load %arg4[%c8_104, %c0_105, %c0_106] : memref<9x32x16xbf16, #tpu.memory_space<vmem>>, vector<1x32x16xbf16>
    %144 = vector.shape_cast %143 : vector<1x32x16xbf16> to vector<32x16xbf16>
    %145 = vector.broadcast %142 : vector<1x16xbf16> to vector<16x16xbf16>
    %146 = arith.mulf %140, %145 : vector<16x16xbf16>
    %cst_107 = arith.constant dense<0.000000e+00> : vector<32x16xf32>
    %147 = tpu.matmul %144, %146, %cst_107 {dimension_numbers = #tpu.dot_dimension_numbers<[1], [0], [0], [1], [0, 0, 1, 1], [], []>} : vector<32x16xbf16>, vector<16x16xbf16>, vector<32x16xf32> -> vector<32x16xf32>
    %148 = arith.addf %139, %147 : vector<32x16xf32>
    %c0_108 = arith.constant 0 : index
    %c8_109 = arith.constant 8 : index
    %c0_110 = arith.constant 0 : index
    %c0_111 = arith.constant 0 : index
    %149 = vector.load %arg6[%c0_108, %c8_109, %c0_110, %c0_111] : memref<1x9x32x1xf32, #tpu.memory_space<vmem>>, vector<1x1x32x1xf32>
    %150 = vector.shape_cast %149 : vector<1x1x32x1xf32> to vector<32x1xf32>
    %151 = arith.extf %142 : vector<1x16xbf16> to vector<1x16xf32>
    %152 = vector.broadcast %150 : vector<32x1xf32> to vector<32x16xf32>
    %153 = vector.broadcast %151 : vector<1x16xf32> to vector<32x16xf32>
    %154 = arith.mulf %152, %153 : vector<32x16xf32>
    %155 = arith.addf %148, %154 : vector<32x16xf32>
    %c0_112 = arith.constant 0 : index
    %c0_113 = arith.constant 0 : index
    %156 = vector.load %arg5[%c0_112, %c0_113] : memref<32x1xf32, #tpu.memory_space<vmem>>, vector<32x1xf32>
    %157 = vector.broadcast %156 : vector<32x1xf32> to vector<32x16xf32>
    %158 = arith.addf %155, %157 : vector<32x16xf32>
    %cst_114 = arith.constant 0.000000e+00 : f32
    %159 = vector.broadcast %cst_114 : f32 to vector<32x16xf32>
    %160 = arith.maximumf %158, %159 : vector<32x16xf32>
    %cst_115 = arith.constant 0.000000e+00 : bf16
    %161 = vector.broadcast %cst_115 : bf16 to vector<32x272xbf16>
    %c0_116 = arith.constant 0 : index
    %c0_117 = arith.constant 0 : index
    %162 = vector.load %arg14[%c0_116, %c0_117] : memref<32x272xbf16, #tpu.memory_space<vmem>>, vector<32x272xbf16>
    tpu.vector_store %arg14[%c0_116, %c0_117], %161 {strides = array<i32>} : memref<32x272xbf16, #tpu.memory_space<vmem>>, vector<32x272xbf16>,
    %163 = arith.truncf %160 : vector<32x16xf32> to vector<32x16xbf16>
    %c0_118 = arith.constant 0 : index
    %c128_119 = arith.constant 128 : index
    %164 = vector.load %arg14[%c0_118, %c128_119] : memref<32x272xbf16, #tpu.memory_space<vmem>>, vector<32x16xbf16>
    tpu.vector_store %arg14[%c0_118, %c128_119], %163 {strides = array<i32>} : memref<32x272xbf16, #tpu.memory_space<vmem>>, vector<32x16xbf16>,
    %cst_120 = arith.constant 0.000000e+00 : f32
    %165 = vector.broadcast %cst_120 : f32 to vector<16x16xf32>
    %c0_121 = arith.constant 0 : index
    %c123_122 = arith.constant 123 : index
    %166 = vector.load %arg14[%c0_121, %c123_122] : memref<32x272xbf16, #tpu.memory_space<vmem>>, vector<32x16xbf16>
    %c0_123 = arith.constant 0 : index
    %c0_124 = arith.constant 0 : index
    %c0_125 = arith.constant 0 : index
    %167 = vector.load %arg11[%c0_123, %c0_124, %c0_125] : memref<9x1x16xbf16, #tpu.memory_space<vmem>>, vector<1x1x16xbf16>
    %168 = vector.shape_cast %167 : vector<1x1x16xbf16> to vector<1x16xbf16>
    %c0_126 = arith.constant 0 : index
    %c0_127 = arith.constant 0 : index
    %c0_128 = arith.constant 0 : index
    %169 = vector.load %arg7[%c0_126, %c0_127, %c0_128] : memref<9x16x32xbf16, #tpu.memory_space<vmem>>, vector<1x16x32xbf16>
    %170 = vector.shape_cast %169 : vector<1x16x32xbf16> to vector<16x32xbf16>
    %171 = vector.broadcast %168 : vector<1x16xbf16> to vector<32x16xbf16>
    %172 = arith.mulf %166, %171 : vector<32x16xbf16>
    %cst_129 = arith.constant dense<0.000000e+00> : vector<16x16xf32>
    %173 = tpu.matmul %170, %172, %cst_129 {dimension_numbers = #tpu.dot_dimension_numbers<[1], [0], [0], [1], [0, 0, 1, 1], [], []>} : vector<16x32xbf16>, vector<32x16xbf16>, vector<16x16xf32> -> vector<16x16xf32>
    %174 = arith.addf %165, %173 : vector<16x16xf32>
    %c0_130 = arith.constant 0 : index
    %c124_131 = arith.constant 124 : index
    %175 = vector.load %arg14[%c0_130, %c124_131] : memref<32x272xbf16, #tpu.memory_space<vmem>>, vector<32x16xbf16>
    %c1_132 = arith.constant 1 : index
    %c0_133 = arith.constant 0 : index
    %c0_134 = arith.constant 0 : index
    %176 = vector.load %arg11[%c1_132, %c0_133, %c0_134] : memref<9x1x16xbf16, #tpu.memory_space<vmem>>, vector<1x1x16xbf16>
    %177 = vector.shape_cast %176 : vector<1x1x16xbf16> to vector<1x16xbf16>
    %c1_135 = arith.constant 1 : index
    %c0_136 = arith.constant 0 : index
    %c0_137 = arith.constant 0 : index
    %178 = vector.load %arg7[%c1_135, %c0_136, %c0_137] : memref<9x16x32xbf16, #tpu.memory_space<vmem>>, vector<1x16x32xbf16>
    %179 = vector.shape_cast %178 : vector<1x16x32xbf16> to vector<16x32xbf16>
    %180 = vector.broadcast %177 : vector<1x16xbf16> to vector<32x16xbf16>
    %181 = arith.mulf %175, %180 : vector<32x16xbf16>
    %cst_138 = arith.constant dense<0.000000e+00> : vector<16x16xf32>
    %182 = tpu.matmul %179, %181, %cst_138 {dimension_numbers = #tpu.dot_dimension_numbers<[1], [0], [0], [1], [0, 0, 1, 1], [], []>} : vector<16x32xbf16>, vector<32x16xbf16>, vector<16x16xf32> -> vector<16x16xf32>
    %183 = arith.addf %174, %182 : vector<16x16xf32>
    %c0_139 = arith.constant 0 : index
    %c125_140 = arith.constant 125 : index
    %184 = vector.load %arg14[%c0_139, %c125_140] : memref<32x272xbf16, #tpu.memory_space<vmem>>, vector<32x16xbf16>
    %c2_141 = arith.constant 2 : index
    %c0_142 = arith.constant 0 : index
    %c0_143 = arith.constant 0 : index
    %185 = vector.load %arg11[%c2_141, %c0_142, %c0_143] : memref<9x1x16xbf16, #tpu.memory_space<vmem>>, vector<1x1x16xbf16>
    %186 = vector.shape_cast %185 : vector<1x1x16xbf16> to vector<1x16xbf16>
    %c2_144 = arith.constant 2 : index
    %c0_145 = arith.constant 0 : index
    %c0_146 = arith.constant 0 : index
    %187 = vector.load %arg7[%c2_144, %c0_145, %c0_146] : memref<9x16x32xbf16, #tpu.memory_space<vmem>>, vector<1x16x32xbf16>
    %188 = vector.shape_cast %187 : vector<1x16x32xbf16> to vector<16x32xbf16>
    %189 = vector.broadcast %186 : vector<1x16xbf16> to vector<32x16xbf16>
    %190 = arith.mulf %184, %189 : vector<32x16xbf16>
    %cst_147 = arith.constant dense<0.000000e+00> : vector<16x16xf32>
    %191 = tpu.matmul %188, %190, %cst_147 {dimension_numbers = #tpu.dot_dimension_numbers<[1], [0], [0], [1], [0, 0, 1, 1], [], []>} : vector<16x32xbf16>, vector<32x16xbf16>, vector<16x16xf32> -> vector<16x16xf32>
    %192 = arith.addf %183, %191 : vector<16x16xf32>
    %c0_148 = arith.constant 0 : index
    %c127_149 = arith.constant 127 : index
    %193 = vector.load %arg14[%c0_148, %c127_149] : memref<32x272xbf16, #tpu.memory_space<vmem>>, vector<32x16xbf16>
    %c3_150 = arith.constant 3 : index
    %c0_151 = arith.constant 0 : index
    %c0_152 = arith.constant 0 : index
    %194 = vector.load %arg11[%c3_150, %c0_151, %c0_152] : memref<9x1x16xbf16, #tpu.memory_space<vmem>>, vector<1x1x16xbf16>
    %195 = vector.shape_cast %194 : vector<1x1x16xbf16> to vector<1x16xbf16>
    %c3_153 = arith.constant 3 : index
    %c0_154 = arith.constant 0 : index
    %c0_155 = arith.constant 0 : index
    %196 = vector.load %arg7[%c3_153, %c0_154, %c0_155] : memref<9x16x32xbf16, #tpu.memory_space<vmem>>, vector<1x16x32xbf16>
    %197 = vector.shape_cast %196 : vector<1x16x32xbf16> to vector<16x32xbf16>
    %198 = vector.broadcast %195 : vector<1x16xbf16> to vector<32x16xbf16>
    %199 = arith.mulf %193, %198 : vector<32x16xbf16>
    %cst_156 = arith.constant dense<0.000000e+00> : vector<16x16xf32>
    %200 = tpu.matmul %197, %199, %cst_156 {dimension_numbers = #tpu.dot_dimension_numbers<[1], [0], [0], [1], [0, 0, 1, 1], [], []>} : vector<16x32xbf16>, vector<32x16xbf16>, vector<16x16xf32> -> vector<16x16xf32>
    %201 = arith.addf %192, %200 : vector<16x16xf32>
    %c0_157 = arith.constant 0 : index
    %c128_158 = arith.constant 128 : index
    %202 = vector.load %arg14[%c0_157, %c128_158] : memref<32x272xbf16, #tpu.memory_space<vmem>>, vector<32x16xbf16>
    %c4_159 = arith.constant 4 : index
    %c0_160 = arith.constant 0 : index
    %c0_161 = arith.constant 0 : index
    %203 = vector.load %arg11[%c4_159, %c0_160, %c0_161] : memref<9x1x16xbf16, #tpu.memory_space<vmem>>, vector<1x1x16xbf16>
    %204 = vector.shape_cast %203 : vector<1x1x16xbf16> to vector<1x16xbf16>
    %c4_162 = arith.constant 4 : index
    %c0_163 = arith.constant 0 : index
    %c0_164 = arith.constant 0 : index
    %205 = vector.load %arg7[%c4_162, %c0_163, %c0_164] : memref<9x16x32xbf16, #tpu.memory_space<vmem>>, vector<1x16x32xbf16>
    %206 = vector.shape_cast %205 : vector<1x16x32xbf16> to vector<16x32xbf16>
    %207 = vector.broadcast %204 : vector<1x16xbf16> to vector<32x16xbf16>
    %208 = arith.mulf %202, %207 : vector<32x16xbf16>
    %cst_165 = arith.constant dense<0.000000e+00> : vector<16x16xf32>
    %209 = tpu.matmul %206, %208, %cst_165 {dimension_numbers = #tpu.dot_dimension_numbers<[1], [0], [0], [1], [0, 0, 1, 1], [], []>} : vector<16x32xbf16>, vector<32x16xbf16>, vector<16x16xf32> -> vector<16x16xf32>
    %210 = arith.addf %201, %209 : vector<16x16xf32>
    %c0_166 = arith.constant 0 : index
    %c129_167 = arith.constant 129 : index
    %211 = vector.load %arg14[%c0_166, %c129_167] : memref<32x272xbf16, #tpu.memory_space<vmem>>, vector<32x16xbf16>
    %c5_168 = arith.constant 5 : index
    %c0_169 = arith.constant 0 : index
    %c0_170 = arith.constant 0 : index
    %212 = vector.load %arg11[%c5_168, %c0_169, %c0_170] : memref<9x1x16xbf16, #tpu.memory_space<vmem>>, vector<1x1x16xbf16>
    %213 = vector.shape_cast %212 : vector<1x1x16xbf16> to vector<1x16xbf16>
    %c5_171 = arith.constant 5 : index
    %c0_172 = arith.constant 0 : index
    %c0_173 = arith.constant 0 : index
    %214 = vector.load %arg7[%c5_171, %c0_172, %c0_173] : memref<9x16x32xbf16, #tpu.memory_space<vmem>>, vector<1x16x32xbf16>
    %215 = vector.shape_cast %214 : vector<1x16x32xbf16> to vector<16x32xbf16>
    %216 = vector.broadcast %213 : vector<1x16xbf16> to vector<32x16xbf16>
    %217 = arith.mulf %211, %216 : vector<32x16xbf16>
    %cst_174 = arith.constant dense<0.000000e+00> : vector<16x16xf32>
    %218 = tpu.matmul %215, %217, %cst_174 {dimension_numbers = #tpu.dot_dimension_numbers<[1], [0], [0], [1], [0, 0, 1, 1], [], []>} : vector<16x32xbf16>, vector<32x16xbf16>, vector<16x16xf32> -> vector<16x16xf32>
    %219 = arith.addf %210, %218 : vector<16x16xf32>
    %c0_175 = arith.constant 0 : index
    %c131_176 = arith.constant 131 : index
    %220 = vector.load %arg14[%c0_175, %c131_176] : memref<32x272xbf16, #tpu.memory_space<vmem>>, vector<32x16xbf16>
    %c6_177 = arith.constant 6 : index
    %c0_178 = arith.constant 0 : index
    %c0_179 = arith.constant 0 : index
    %221 = vector.load %arg11[%c6_177, %c0_178, %c0_179] : memref<9x1x16xbf16, #tpu.memory_space<vmem>>, vector<1x1x16xbf16>
    %222 = vector.shape_cast %221 : vector<1x1x16xbf16> to vector<1x16xbf16>
    %c6_180 = arith.constant 6 : index
    %c0_181 = arith.constant 0 : index
    %c0_182 = arith.constant 0 : index
    %223 = vector.load %arg7[%c6_180, %c0_181, %c0_182] : memref<9x16x32xbf16, #tpu.memory_space<vmem>>, vector<1x16x32xbf16>
    %224 = vector.shape_cast %223 : vector<1x16x32xbf16> to vector<16x32xbf16>
    %225 = vector.broadcast %222 : vector<1x16xbf16> to vector<32x16xbf16>
    %226 = arith.mulf %220, %225 : vector<32x16xbf16>
    %cst_183 = arith.constant dense<0.000000e+00> : vector<16x16xf32>
    %227 = tpu.matmul %224, %226, %cst_183 {dimension_numbers = #tpu.dot_dimension_numbers<[1], [0], [0], [1], [0, 0, 1, 1], [], []>} : vector<16x32xbf16>, vector<32x16xbf16>, vector<16x16xf32> -> vector<16x16xf32>
    %228 = arith.addf %219, %227 : vector<16x16xf32>
    %c0_184 = arith.constant 0 : index
    %c132_185 = arith.constant 132 : index
    %229 = vector.load %arg14[%c0_184, %c132_185] : memref<32x272xbf16, #tpu.memory_space<vmem>>, vector<32x16xbf16>
    %c7_186 = arith.constant 7 : index
    %c0_187 = arith.constant 0 : index
    %c0_188 = arith.constant 0 : index
    %230 = vector.load %arg11[%c7_186, %c0_187, %c0_188] : memref<9x1x16xbf16, #tpu.memory_space<vmem>>, vector<1x1x16xbf16>
    %231 = vector.shape_cast %230 : vector<1x1x16xbf16> to vector<1x16xbf16>
    %c7_189 = arith.constant 7 : index
    %c0_190 = arith.constant 0 : index
    %c0_191 = arith.constant 0 : index
    %232 = vector.load %arg7[%c7_189, %c0_190, %c0_191] : memref<9x16x32xbf16, #tpu.memory_space<vmem>>, vector<1x16x32xbf16>
    %233 = vector.shape_cast %232 : vector<1x16x32xbf16> to vector<16x32xbf16>
    %234 = vector.broadcast %231 : vector<1x16xbf16> to vector<32x16xbf16>
    %235 = arith.mulf %229, %234 : vector<32x16xbf16>
    %cst_192 = arith.constant dense<0.000000e+00> : vector<16x16xf32>
    %236 = tpu.matmul %233, %235, %cst_192 {dimension_numbers = #tpu.dot_dimension_numbers<[1], [0], [0], [1], [0, 0, 1, 1], [], []>} : vector<16x32xbf16>, vector<32x16xbf16>, vector<16x16xf32> -> vector<16x16xf32>
    %237 = arith.addf %228, %236 : vector<16x16xf32>
    %c0_193 = arith.constant 0 : index
    %c133_194 = arith.constant 133 : index
    %238 = vector.load %arg14[%c0_193, %c133_194] : memref<32x272xbf16, #tpu.memory_space<vmem>>, vector<32x16xbf16>
    %c8_195 = arith.constant 8 : index
    %c0_196 = arith.constant 0 : index
    %c0_197 = arith.constant 0 : index
    %239 = vector.load %arg11[%c8_195, %c0_196, %c0_197] : memref<9x1x16xbf16, #tpu.memory_space<vmem>>, vector<1x1x16xbf16>
    %240 = vector.shape_cast %239 : vector<1x1x16xbf16> to vector<1x16xbf16>
    %c8_198 = arith.constant 8 : index
    %c0_199 = arith.constant 0 : index
    %c0_200 = arith.constant 0 : index
    %241 = vector.load %arg7[%c8_198, %c0_199, %c0_200] : memref<9x16x32xbf16, #tpu.memory_space<vmem>>, vector<1x16x32xbf16>
    %242 = vector.shape_cast %241 : vector<1x16x32xbf16> to vector<16x32xbf16>
    %243 = vector.broadcast %240 : vector<1x16xbf16> to vector<32x16xbf16>
    %244 = arith.mulf %238, %243 : vector<32x16xbf16>
    %cst_201 = arith.constant dense<0.000000e+00> : vector<16x16xf32>
    %245 = tpu.matmul %242, %244, %cst_201 {dimension_numbers = #tpu.dot_dimension_numbers<[1], [0], [0], [1], [0, 0, 1, 1], [], []>} : vector<16x32xbf16>, vector<32x16xbf16>, vector<16x16xf32> -> vector<16x16xf32>
    %246 = arith.addf %237, %245 : vector<16x16xf32>
    %c0_202 = arith.constant 0 : index
    %c0_203 = arith.constant 0 : index
    %247 = vector.load %arg8[%c0_202, %c0_203] : memref<16x1xf32, #tpu.memory_space<vmem>>, vector<16x1xf32>
    %248 = vector.broadcast %247 : vector<16x1xf32> to vector<16x16xf32>
    %249 = arith.addf %246, %248 : vector<16x16xf32>
    %cst_204 = arith.constant 0.000000e+00 : f32
    %250 = vector.broadcast %cst_204 : f32 to vector<16x16xf32>
    %251 = arith.maximumf %249, %250 : vector<16x16xf32>
    %c0_205 = arith.constant 0 : index
    %c0_206 = arith.constant 0 : index
    %252 = vector.load %arg9[%c0_205, %c0_206] : memref<16x16xbf16, #tpu.memory_space<vmem>>, vector<16x16xbf16>
    %253 = arith.truncf %251 : vector<16x16xf32> to vector<16x16xbf16>
    %cst_207 = arith.constant dense<0.000000e+00> : vector<16x16xf32>
    %254 = tpu.matmul %252, %253, %cst_207 {dimension_numbers = #tpu.dot_dimension_numbers<[1], [0], [0], [1], [0, 0, 1, 1], [], []>} : vector<16x16xbf16>, vector<16x16xbf16>, vector<16x16xf32> -> vector<16x16xf32>
    %c0_208 = arith.constant 0 : index
    %c0_209 = arith.constant 0 : index
    %255 = vector.load %arg10[%c0_208, %c0_209] : memref<16x1xf32, #tpu.memory_space<vmem>>, vector<16x1xf32>
    %256 = vector.broadcast %255 : vector<16x1xf32> to vector<16x16xf32>
    %257 = arith.addf %254, %256 : vector<16x16xf32>
    %c0_210 = arith.constant 0 : index
    %c0_211 = arith.constant 0 : index
    %c0_212 = arith.constant 0 : index
    %258 = vector.load %arg12[%c0_210, %c0_211, %c0_212] : memref<1x16x16xf32, #tpu.memory_space<vmem>>, vector<1x16x16xf32>
    %259 = vector.shape_cast %258 : vector<1x16x16xf32> to vector<16x16xf32>
    %260 = vector.shape_cast %257 : vector<16x16xf32> to vector<1x16x16xf32>
    tpu.vector_store %arg12[%c0_210, %c0_211, %c0_212], %260 {strides = array<i32>} : memref<1x16x16xf32, #tpu.memory_space<vmem>>, vector<1x16x16xf32>,
    return
  }
  func.func @transform_0(%arg0: i32) -> (i32, i32, i32) {
    %c0_i32 = arith.constant 0 : i32
    %c0_i32_0 = arith.constant 0 : i32
    %c0_i32_1 = arith.constant 0 : i32
    return %arg0, %c0_i32, %c0_i32_0 : i32, i32, i32
  }
  func.func @transform_1(%arg0: i32) -> (i32, i32) {
    %c0_i32 = arith.constant 0 : i32
    %c0_i32_0 = arith.constant 0 : i32
    %c0_i32_1 = arith.constant 0 : i32
    return %c0_i32, %c0_i32_0 : i32, i32
  }
  func.func @transform_2(%arg0: i32) -> (i32, i32) {
    %c0_i32 = arith.constant 0 : i32
    %c0_i32_0 = arith.constant 0 : i32
    %c0_i32_1 = arith.constant 0 : i32
    return %c0_i32, %c0_i32_0 : i32, i32
  }
  func.func @transform_3(%arg0: i32) -> (i32, i32, i32) {
    %c0_i32 = arith.constant 0 : i32
    %c0_i32_0 = arith.constant 0 : i32
    %c0_i32_1 = arith.constant 0 : i32
    %c0_i32_2 = arith.constant 0 : i32
    return %c0_i32, %c0_i32_0, %c0_i32_1 : i32, i32, i32
  }
  func.func @transform_4(%arg0: i32) -> (i32, i32) {
    %c0_i32 = arith.constant 0 : i32
    %c0_i32_0 = arith.constant 0 : i32
    %c0_i32_1 = arith.constant 0 : i32
    return %c0_i32, %c0_i32_0 : i32, i32
  }
  func.func @transform_5(%arg0: i32) -> (i32, i32, i32, i32) {
    %c0_i32 = arith.constant 0 : i32
    %c0_i32_0 = arith.constant 0 : i32
    %c0_i32_1 = arith.constant 0 : i32
    %c0_i32_2 = arith.constant 0 : i32
    return %arg0, %c0_i32, %c0_i32_0, %c0_i32_1 : i32, i32, i32, i32
  }
  func.func @transform_6(%arg0: i32) -> (i32, i32, i32) {
    %c0_i32 = arith.constant 0 : i32
    %c0_i32_0 = arith.constant 0 : i32
    %c0_i32_1 = arith.constant 0 : i32
    %c0_i32_2 = arith.constant 0 : i32
    return %c0_i32, %c0_i32_0, %c0_i32_1 : i32, i32, i32
  }
  func.func @transform_7(%arg0: i32) -> (i32, i32) {
    %c0_i32 = arith.constant 0 : i32
    %c0_i32_0 = arith.constant 0 : i32
    %c0_i32_1 = arith.constant 0 : i32
    return %c0_i32, %c0_i32_0 : i32, i32
  }
  func.func @transform_8(%arg0: i32) -> (i32, i32) {
    %c0_i32 = arith.constant 0 : i32
    %c0_i32_0 = arith.constant 0 : i32
    %c0_i32_1 = arith.constant 0 : i32
    return %c0_i32, %c0_i32_0 : i32, i32
  }
  func.func @transform_9(%arg0: i32) -> (i32, i32) {
    %c0_i32 = arith.constant 0 : i32
    %c0_i32_0 = arith.constant 0 : i32
    %c0_i32_1 = arith.constant 0 : i32
    return %c0_i32, %c0_i32_0 : i32, i32
  }
  func.func @transform_10(%arg0: i32) -> (i32, i32, i32) {
    %c0_i32 = arith.constant 0 : i32
    %c0_i32_0 = arith.constant 0 : i32
    %c0_i32_1 = arith.constant 0 : i32
    %c0_i32_2 = arith.constant 0 : i32
    return %c0_i32, %c0_i32_0, %c0_i32_1 : i32, i32, i32
  }
  func.func @transform_11(%arg0: i32) -> (i32, i32, i32) {
    %c0_i32 = arith.constant 0 : i32
    %c0_i32_0 = arith.constant 0 : i32
    %c0_i32_1 = arith.constant 0 : i32
    return %arg0, %c0_i32, %c0_i32_0 : i32, i32, i32
  }
}

</mosaic_0001>

<bundles_post_ra>
// kernel: _lambda_.2
= control target key start
LH: loop header
LB: loop body
LE: loop exit
PB: predicated region body
PF: predicated region fallthrough
CT: control target
= control target key end

     0   :  { %s1597_s21 = smov 0   ;;  %s1772_s0 = inlined_call_operand.vmem [shape: bf16[2,12,64], index: 0, kind: input, shape index: {}]   ;;  %s1773_s1 = inlined_call_operand.vmem [shape: bf16[16,12], index: 1, kind: input, shape index: {}]   ;;  %s1774_s2 = inlined_call_operand.vmem [shape: f32[16,1], index: 2, kind: input, shape index: {}]   ;;  %s1775_s3 = inlined_call_operand.vmem [shape: bf16[9,32,16], index: 3, kind: input, shape index: {}]   ;;  %s1776_s4 = inlined_call_operand.vmem [shape: f32[32,1], index: 4, kind: input, shape index: {}]   ;;  %s1777_s5 = inlined_call_operand.vmem [shape: bf16[9,1,64], index: 5, kind: input, shape index: {}]   ;;  %s1778_s6 = inlined_call_operand.vmem [shape: bf16[2,32,64], index: 6, kind: output, shape index: {}]  }
   0x1 LB: > { %s1281_s22 = sadd.s32 4294967295, %s1549_s21   ;;  %p1285_p0 = scmp.ge.s32.totalorder %s1549_s21, 1  ;;  %s1549_s21 = sphi %s1597_s21, %s16_s21  }
   0x2   : > { %p212_p1 = scmp.lt.s32.totalorder %s1549_s21, 3 }
   0x4   : > { %p213_p2 = pnand %p1285_p0, %p212_p1 }
   0x5   : > { %p242_p3 = scmp.lt.s32.totalorder (!%p213_p2), %s1281_s22, 1  ;;  %v346_v0 = vlaneseq (!%p213_p2)  ;;  %v1551_v1 = vmov (!%p213_p2), 0.0   ;;  %vm1552_vm0 = vmmov (!%p213_p2), 0   ;;  %v257_v2 = vld [vmem:[%s1774_s2] sm:$0xff] (!%p213_p2)  ;;  %v1553_v3 = vmov (!%p213_p2), 0   ;;  %v258_v8 = vld [vmem:[%s1774_s2 + $0x8] sm:$0xff] (!%p213_p2) }
   0x6   : > { %216 = sbr.rel (%p213_p2) target bundleno = 632 (0x278), region = 44  ;;  %1410 = vmatprep.subr.bf16.mxu0 (!%p213_p2), %v1551_v1  ;;  %1412 = vmatprep.mubr.msk.bf16.mxu0 (!%p213_p2), %vm1552_vm0, %v1551_v1  ;;  %331 = vst [vmem:[#allocation2 + $0x8] sm:$0xff] (!%p213_p2), %v1553_v3  ;;  %v1293_v5 = vld [vmem:[%s1777_s5 + $0x1] sm:$0x1] (!%p213_p2)  ;;  %vm283_vm1 = vcmask (!%p213_p2), 1045504   ;;  %vm279_vm2 = vcmask (!%p213_p2), 97280  }
   0x7   : > { %1521 = vset.pattern.permute.xlu0 (!%p213_p2), %v1553_v3  ;;  %v347_v4 = vshrl.u32 (!%p213_p2), %v346_v0, 7  ;;  %1522 = vset.pattern.permute.xlu1 (!%p213_p2), %v1553_v3  ;;  %v364_v6 = vpack.i.b16 (!%p213_p2), %v1293_v5, %v1293_v5  ;;  %v1333_v7 = vld [vmem:[%s1777_s5 + $0x5] sm:$0x1] (!%p213_p2)  ;;  %v338_v11 = vld [vmem:[%s1777_s5] sm:$0x1] (!%p213_p2)  ;;  %s1554_s23 = smov (!%p213_p2), 120  }
   0x8   : > { %261 = vperm.xlu0 (!%p213_p2), %1521, %v257_v2   ;;  %v813_v10 = vpack.i.b16 (!%p213_p2), %v1333_v7, %v1333_v7  ;;  %v1342_v12 = vld [vmem:[%s1777_s5 + $0x6] sm:$0x1] (!%p213_p2)  ;;  %v344_v13 = vpack.i.b16 (!%p213_p2), %v338_v11, %v338_v11  ;;  %v1306_v14 = vld [vmem:[%s1777_s5 + $0x2] sm:$0x1] (!%p213_p2)  ;;  %v1351_v19 = vld [vmem:[%s1777_s5 + $0x7] sm:$0x1] (!%p213_p2) }
   0x9   : > { %v1620_v9 = vsub.s32 (!%p213_p2), 0, %v347_v4  ;;  %v1524_v16 = vld [vmem:[%s1773_s1] sm:$0xff] (!%p213_p2)   ;;  %v533_v20 = vpack.i.b16 (!%p213_p2), %v1306_v14, %v1306_v14  ;;  %v905_v23 = vpack.i.b16 (!%p213_p2), %v1342_v12, %v1342_v12  ;;  %s1555_s26 = smov (!%p213_p2), 119   ;;  %v1360_v26 = vld [vmem:[%s1777_s5 + $0x8] sm:$0x1] (!%p213_p2)  ;;  %v997_v29 = vpack.i.b16 (!%p213_p2), %v1351_v19, %v1351_v19  ;;  %s1557_s30 = smov (!%p213_p2), 121  }
   0xa   : > { %v1315_v24 = vld [vmem:[%s1777_s5 + $0x3] sm:$0x1] (!%p213_p2)  ;;  %s1558_s7 = smov (!%p213_p2), 7   ;;  %v1089_v32 = vpack.i.b16 (!%p213_p2), %v1360_v26, %v1360_v26  ;;  %s1559_s8 = smov (!%p213_p2), 127   ;;  %vm332_vm3 = vcmask (!%p213_p2), 523264   ;;  %vm395_vm4 = vcmask (!%p213_p2), 130048  }
   0xb   : > { %v369_v17 = vrot.slane (!%p213_p2), %v364_v6, %v1620_v9  ;;  %v349_v18 = vrot.slane (!%p213_p2), %v344_v13, %v1620_v9  ;;  %v818_v22 = vrot.slane (!%p213_p2), %v813_v10, %v1620_v9  ;;  %v538_v25 = vrot.slane (!%p213_p2), %v533_v20, %v1620_v9  ;;  %s1560_s9 = smov (!%p213_p2), 8   ;;  %s1561_s10 = smov (!%p213_p2), 9   ;;  %v1525_v36 = vld [vmem:[%s1775_s3 + $0x40] sm:$0xff] (!%p213_p2)   ;;  %v1528_v50 = vld [vmem:[%s1775_s3 + $0x10] sm:$0xff] (!%p213_p2)   ;;  %v1526_v58 = vld [vmem:[%s1775_s3 + $0x48] sm:$0xff] (!%p213_p2)  }
   0xc   : > { %266 = vperm.xlu0 (!%p213_p2), %1521, %v258_v8   ;;  %v631_v27 = vpack.i.b16 (!%p213_p2), %v1315_v24, %v1315_v24  ;;  %v910_v28 = vrot.slane (!%p213_p2), %v905_v23, %v1620_v9  ;;  %v1002_v31 = vrot.slane (!%p213_p2), %v997_v29, %v1620_v9  ;;  %v1094_v33 = vrot.slane (!%p213_p2), %v1089_v32, %v1620_v9  ;;  %v1324_v48 = vld [vmem:[%s1777_s5 + $0x4] sm:$0x1] (!%p213_p2)  ;;  %v1527_v61 = vld [vmem:[%s1775_s3 + $0x50] sm:$0xff] (!%p213_p2)   ;;  %v1174_v12 = vld [vmem:[%s1776_s4 + $0x8] sm:$0xff] (!%p213_p2) }
   0xd   : > { %s1780_s22 = smov (!%p242_p3, %s1281_s22), 1  ;;  %371 = vrot.lane.b32.xlu1 %v369_v17, %s1554_s23  ;;  %1442 = vmatprep.mubr.msk.bf16.mxu1 %vm395_vm4, %v1525_v36  ;;  %v729_v49 = vpack.i.b16 %v1324_v48, %v1324_v48  ;;  %v1175_v11 = vld [vmem:[%s1776_s4 + $0x10] sm:$0xff]  ;;  %v1176_v13 = vld [vmem:[%s1776_s4 + $0x18] sm:$0xff]  ;;  %vm392_vm5 = vcmask 64512   ;;  %vm467_vm6 = vcmask 72704   ;;  %vm561_vm7 = vcmask 56320  }
   0xe   : > { %s1375_s29 = sshll.u32 %s1780_s22, 3  ;;  %v636_v30 = vrot.slane %v631_v27, %v1620_v9  ;;  %vm659_vm8 = vcmask 7168   ;;  %s1376_s13 = sshll.u32 %s1780_s22, 4  ;;  %vm1221_vm9 = vcmask 519168  }
   0xf   : > { %s246_s12 = scalar_lea.vmem %s1772_s0, %s1375_s29  ;;  %s1556_s29 = smov 1   ;;  %v734_v51 = vrot.slane %v729_v49, %v1620_v9  ;;  %v1173_v9 = vld [vmem:[%s1776_s4] sm:$0xff] }
  0x10   : > { %v1523_v15 = vld [vmem:[%s246_s12] sm:$0x3f]   ;;  %351 = vrot.lane.b32.xlu0 %v349_v18, %s1555_s26  ;;  %s251_s16 = scalar_lea.vmem %s1778_s6, %s1376_s13 }
  0x11   : > { %v285_v21 = vsel %vm283_vm1, %v1523_v15, 0  ;;  %820 = vrot.lane.b32.xlu1 %v818_v22, %s1556_s29  ;;  %v1531_v18 = vld [vmem:[%s1775_s3 + $0x60] sm:$0xff]  }
  0x12   : > { %1411 = vmatpush3.bf16.msra.mxu0 %v285_v21  ;;  %v1530_v21 = vld [vmem:[%s1775_s3 + $0x18] sm:$0xff]   ;;  %v1532_v22 = vld [vmem:[%s1775_s3] sm:$0xff]  }
  0x14   : > { %540 = vrot.lane.b32.xlu0 %v538_v25, %s1557_s30 }
  0x15   : > { %1413 = vmatmul.mubr.msk.bf16.vlgmr.msra.gmra.mrb[0].mxu0 %vm279_vm2, %v1524_v16  ;;  %912 = vrot.lane.b32.xlu1 %v910_v28, %s1558_s7  ;;  %v1529_v16 = vld [vmem:[%s1775_s3 + $0x58] sm:$0xff]   ;;  %v1533_v28 = vld [vmem:[%s1775_s3 + $0x68] sm:$0xff]  }
  0x16   : > { %1418 = vmatprep.mubr.msk.bf16.mxu0 %vm395_vm4, %v1528_v50 }
  0x18   : > { %638 = vrot.lane.b32.xlu0 %v636_v30, %s1559_s8  ;;  %v1535_v30 = vld [vmem:[%s1775_s3 + $0x70] sm:$0xff]  }
  0x19   : > { %1004 = vrot.lane.b32.xlu1 %v1002_v31, %s1560_s9 }
  0x1d   : > { %1096 = vrot.lane.b32.xlu1 %v1094_v33, %s1561_s10  ;;  %v1534_v33 = vld [vmem:[%s1775_s3 + $0x8] sm:$0xff]  }
  0x7f   : > { %v372_v34 = vpop.permute.xlu1 %371 }
  0x80   : > { %v374_v35 = vmul.bf16 0, %v372_v34 }
  0x82   : > { %388 = vrot.lane.b32.xlu0 %v374_v35, %s1560_s9 }
  0x83   : > { %v821_v52 = vpop.permute.xlu1 %820 }
  0x87   : > { %v262_v37 = vpop.permute.xlu0 %261  ;;  %v913_v62 = vpop.permute.xlu1 %912 }
  0x8b   : > { %v267_v41 = vpop.permute.xlu0 %266  ;;  %v1005_v2 = vpop.permute.xlu1 %1004 }
  0x8f   : > { %v352_v54 = vpop.permute.xlu0 %351  ;;  %v1097_v8 = vpop.permute.xlu1 %1096 }
  0x90   : > { %v354_v59 = vmul.bf16 0, %v352_v54 }
  0x93   : > { %v541_v63 = vpop.permute.xlu0 %540 }
  0x94   : > { %v543_v0 = vmul.bf16 0, %v541_v63 }
  0x97   : > { %v639_v4 = vpop.permute.xlu0 %638 }
  0x98   : > { %v641_v6 = vmul.bf16 0, %v639_v4 }
  0xe8   : > { %v321_v38 = vpop.f32.mrb[0].mxu0 }
  0xe9   : > { %v322_v39 = vadd.f32 %v321_v38, %v262_v37  ;;  %v1414_v40 = vpop.f32.mrb[1].mxu0  ;;  %v1537_v38 = vld [vmem:[%s1775_s3 + $0x78] sm:$0xff]  }
  0xea   : > { %v324_v42 = vpop.f32.mrb[2].mxu0  ;;  %v1538_v40 = vld [vmem:[%s1775_s3 + $0x28] sm:$0xff]  }
  0xeb   : > { %v325_v43 = vadd.f32 %v324_v42, %v267_v41  ;;  %v1415_v44 = vpop.f32.mrb[3].mxu0  ;;  %v328_v45 = vmax.f32 %v322_v39, 0.0  ;;  %v1539_v39 = vld [vmem:[%s1775_s3 + $0x80] sm:$0xff]   ;;  %v1540_v41 = vld [vmem:[%s1775_s3 + $0x30] sm:$0xff]   ;;  %v1541_v42 = vld [vmem:[%s1775_s3 + $0x88] sm:$0xff]  }
  0xed   : > { %v329_v46 = vmax.f32 %v325_v43, 0.0  ;;  %v1542_v43 = vld [vmem:[%s1775_s3 + $0x38] sm:$0xff]  }
  0xef   : > { %v334_v47 = vpack.c.bf16 %v329_v46, %v328_v45 }
  0xf1   : > { %335 = vst.msk [vmem:[#allocation2 + $0x8] sm:$0xff] %vm332_vm3, %v334_v47 }
  0xf4   : > { %v389_v14 = vpop.permute.xlu0 %388 }
  0xf8   : > { %v337_v53 = vld [vmem:[#allocation2 + $0x8] sm:$0xff] }
  0xf9   : > { %v823_v55 = vmul.bf16 %v821_v52, %v337_v53  ;;  %v735_v56 = vmul.bf16 %v734_v51, %v337_v53  ;;  %v375_v57 = vmul.bf16 %v372_v34, %v337_v53  ;;  %v355_v60 = vmul.bf16 %v352_v54, %v337_v53  ;;  %v1536_v34 = vld [vmem:[%s1775_s3 + $0x20] sm:$0xff]  }
  0xfa   : > { %v915_v1 = vmul.bf16 %v913_v62, %v337_v53  ;;  %v1007_v3 = vmul.bf16 %v1005_v2, %v337_v53  ;;  %v544_v5 = vmul.bf16 %v541_v63, %v337_v53  ;;  %v642_v7 = vmul.bf16 %v639_v4, %v337_v53 }
  0xfb   : > { %835 = vrot.lane.b32.xlu0 %v823_v55, %s1559_s8  ;;  %1440 = vmatprep.subr.bf16.mxu1 %v735_v56  ;;  %v1099_v10 = vmul.bf16 %v1097_v8, %v337_v53 }
  0xfc   : > { %390 = vrot.lane.b32.xlu1 %v375_v57, %s1560_s9  ;;  %1441 = vmatpush3.bf16.msra.mxu1 %v735_v56 }
  0xff   : > { %465 = vrot.lane.b32.xlu0 %v355_v60, %s1561_s10  ;;  %1443 = vmatmul.mubr.msk.bf16.vlgmr.msra.gmra.mrb[0].mxu1 %vm395_vm4, %v1526_v58 }
 0x100   : > { %463 = vrot.lane.b32.xlu1 %v354_v59, %s1561_s10  ;;  %1448 = vmatprep.mubr.msk.bf16.mxu1 %vm395_vm4, %v1527_v61 }
 0x103   : > { %557 = vrot.lane.b32.xlu0 %v543_v0, %s1558_s7 }
 0x104   : > { %927 = vrot.lane.b32.xlu1 %v915_v1, %s1557_s30 }
 0x107   : > { %1019 = vrot.lane.b32.xlu0 %v1007_v3, %s1554_s23 }
 0x108   : > { %559 = vrot.lane.b32.xlu1 %v544_v5, %s1558_s7 }
 0x10b   : > { %657 = vrot.lane.b32.xlu0 %v642_v7, %s1556_s29 }
 0x10c   : > { %655 = vrot.lane.b32.xlu1 %v641_v6, %s1556_s29 }
 0x10f   : > { %1179 = vperm.xlu0 %1521, %v1173_v9  }
 0x110   : > { %1111 = vrot.lane.b32.xlu1 %v1099_v10, %s1555_s26 }
 0x113   : > { %1189 = vperm.xlu0 %1521, %v1175_v11  }
 0x114   : > { %1184 = vperm.xlu1 %1522, %v1174_v12  }
 0x118   : > { %1194 = vperm.xlu1 %1522, %v1176_v13  }
 0x16d   : > { %v836_v15 = vpop.permute.xlu0 %835 }
 0x16e   : > { %1446 = vmatprep.subr.bf16.mxu1 %v836_v15  ;;  %v391_v17 = vpop.permute.xlu1 %390 }
 0x16f   : > { %1447 = vmatpush3.bf16.msra.mxu1 %v836_v15  ;;  %v393_v19 = vsel %vm392_vm5, %v389_v14, %v391_v17 }
 0x170   : > { %1416 = vmatprep.subr.bf16.mxu0 %v393_v19 }
 0x171   : > { %v466_v20 = vpop.permute.xlu0 %465  ;;  %1417 = vmatpush3.bf16.msra.mxu0 %v393_v19 }
 0x172   : > { %1449 = vmatmul.mubr.msk.bf16.vlgmr.msra.gmra.mrb[0].mxu1 %vm395_vm4, %v1529_v16  ;;  %v464_v23 = vpop.permute.xlu1 %463 }
 0x173   : > { %1454 = vmatprep.mubr.msk.bf16.mxu1 %vm395_vm4, %v1531_v18  ;;  %v468_v24 = vsel %vm467_vm6, %v464_v23, %v466_v20 }
 0x174   : > { %1419 = vmatmul.mubr.msk.bf16.vlgmr.msra.gmra.mrb[4].mxu0 %vm395_vm4, %v1530_v21  ;;  %1422 = vmatprep.subr.bf16.mxu0 %v468_v24 }
 0x175   : > { %v558_v25 = vpop.permute.xlu0 %557  ;;  %1423 = vmatpush3.bf16.msra.mxu0 %v468_v24  ;;  %1424 = vmatprep.mubr.msk.bf16.mxu0 %vm395_vm4, %v1532_v22 }
 0x176   : > { %v928_v26 = vpop.permute.xlu1 %927 }
 0x177   : > { %1452 = vmatprep.subr.bf16.mxu1 %v928_v26 }
 0x178   : > { %1453 = vmatpush3.bf16.msra.mxu1 %v928_v26 }
 0x179   : > { %v1020_v27 = vpop.permute.xlu0 %1019 }
 0x17a   : > { %1458 = vmatprep.subr.bf16.mxu1 %v1020_v27  ;;  %v560_v29 = vpop.permute.xlu1 %559 }
 0x17b   : > { %v562_v31 = vsel %vm561_vm7, %v558_v25, %v560_v29 }
 0x17c   : > { %1428 = vmatprep.subr.bf16.mxu0 %v562_v31 }
 0x17d   : > { %v658_v32 = vpop.permute.xlu0 %657 }
 0x17e   : > { %1455 = vmatmul.mubr.msk.bf16.vlgmr.msra.gmra.mrb[0].mxu1 %vm395_vm4, %v1533_v28  ;;  %v656_v35 = vpop.permute.xlu1 %655 }
 0x17f   : > { %1459 = vmatpush3.bf16.msra.mxu1 %v1020_v27  ;;  %1460 = vmatprep.mubr.msk.bf16.mxu1 %vm395_vm4, %v1535_v30  ;;  %v660_v36 = vsel %vm659_vm8, %v656_v35, %v658_v32 }
 0x180   : > { %1425 = vmatmul.mubr.msk.bf16.vlgmr.msra.gmra.mrb[4].mxu0 %vm395_vm4, %v1534_v33 }
 0x181   : > { %1429 = vmatpush3.bf16.msra.mxu0 %v562_v31  ;;  %1430 = vmatprep.mubr.msk.bf16.mxu0 %vm395_vm4, %v1536_v34 }
 0x182   : > { %1434 = vmatprep.subr.bf16.mxu0 %v660_v36  ;;  %v1112_v37 = vpop.permute.xlu1 %1111 }
 0x183   : > { %1464 = vmatprep.subr.bf16.mxu1 %v1112_v37 }
 0x18a   : > { %1461 = vmatmul.mubr.msk.bf16.vlgmr.msra.gmra.mrb[0].mxu1 %vm395_vm4, %v1537_v38 }
 0x18b   : > { %1465 = vmatpush3.bf16.msra.mxu1 %v1112_v37  ;;  %1466 = vmatprep.mubr.msk.bf16.mxu1 %vm395_vm4, %v1539_v39 }
 0x18c   : > { %1431 = vmatmul.mubr.msk.bf16.vlgmr.msra.gmra.mrb[4].mxu0 %vm395_vm4, %v1538_v40 }
 0x18d   : > { %1435 = vmatpush3.bf16.msra.mxu0 %v660_v36  ;;  %1436 = vmatprep.mubr.msk.bf16.mxu0 %vm395_vm4, %v1540_v41 }
 0x18e   : > { %v1180_v44 = vpop.permute.xlu0 %1179 }
 0x192   : > { %v1190_v53 = vpop.permute.xlu0 %1189 }
 0x193   : > { %v1185_v46 = vpop.permute.xlu1 %1184 }
 0x196   : > { %1467 = vmatmul.mubr.msk.bf16.vlgmr.msra.gmra.mrb[0].mxu1 %vm395_vm4, %v1541_v42 }
 0x197   : > { %v1195_v61 = vpop.permute.xlu1 %1194 }
 0x198   : > { %1437 = vmatmul.mubr.msk.bf16.vlgmr.msra.gmra.mrb[4].mxu0 %vm395_vm4, %v1542_v43 }
 0x269   : > { %v1468_v45 = vpop.f32.mrb[0].mxu1 }
 0x26a   : > { %v1154_v47 = vpop.f32.mrb[1].mxu1 }
 0x26b   : > { %v1469_v48 = vpop.f32.mrb[2].mxu1  ;;  %v1438_v49 = vpop.f32.mrb[4].mxu0 }
 0x26c   : > { %v1157_v50 = vpop.f32.mrb[3].mxu1  ;;  %v1470_v51 = vadd.f32 %v1468_v45, %v1438_v49  ;;  %v702_v52 = vpop.f32.mrb[5].mxu0 }
 0x26d   : > { %v1471_v54 = vadd.f32 %v1154_v47, %v702_v52  ;;  %v1439_v55 = vpop.f32.mrb[6].mxu0 }
 0x26e   : > { %v1199_v56 = vadd.f32 %v1470_v51, %v1190_v53  ;;  %v1472_v57 = vadd.f32 %v1469_v48, %v1439_v55  ;;  %v705_v58 = vpop.f32.mrb[7].mxu0 }
 0x26f   : > { %v1197_v59 = vadd.f32 %v1471_v54, %v1180_v44  ;;  %v1473_v60 = vadd.f32 %v1157_v50, %v705_v58 }
 0x270   : > { %v1203_v62 = vmax.f32 %v1199_v56, 0.0  ;;  %v1200_v63 = vadd.f32 %v1472_v57, %v1195_v61 }
 0x271   : > { %v1201_v0 = vmax.f32 %v1197_v59, 0.0  ;;  %v1198_v1 = vadd.f32 %v1473_v60, %v1185_v46 }
 0x272   : > { %v1379_v2 = vpack.c.bf16 %v1203_v62, %v1203_v62  ;;  %v1204_v3 = vmax.f32 %v1200_v63, 0.0 }
 0x273   : > { %v1377_v4 = vpack.c.bf16 %v1201_v0, %v1201_v0  ;;  %v1202_v5 = vmax.f32 %v1198_v1, 0.0 }
 0x274   : > { %1224 = vst.msk [vmem:[%s251_s16 + $0x8] sm:$0xf] %vm1221_vm9, %v1379_v2  ;;  %v1380_v6 = vpack.c.bf16 %v1204_v3, %v1204_v3 }
 0x275   : > { %1222 = vst.msk [vmem:[%s251_s16] sm:$0xf] %vm1221_vm9, %v1377_v4  ;;  %v1378_v7 = vpack.c.bf16 %v1202_v5, %v1202_v5 }
 0x276   : > { %1225 = vst.msk [vmem:[%s251_s16 + $0xc] sm:$0xf] %vm1221_vm9, %v1380_v6 }
 0x277   : > { %1223 = vst.msk [vmem:[%s251_s16 + $0x4] sm:$0xf] %vm1221_vm9, %v1378_v7 }
 0x278 PF: > { %s16_s21 = sadd.s32 1, %s1549_s21  }
 0x279   : > { %p13_p4 = scmp.ge.s32.totalorder %s16_s21, 4  }
 0x27b   :  { %15 = sbr.rel (!%p13_p4) target bundleno = 1 (0x1), region = 90 }

// kernel: _lambda_.3
= control target key start
LH: loop header
LB: loop body
LE: loop exit
PB: predicated region body
PF: predicated region fallthrough
CT: control target
= control target key end

     0   :  { %s3214_s17 = smov 0   ;;  %s3711_s0 = inlined_call_operand.vmem [shape: bf16[2,128,16], index: 0, kind: input, shape index: {}]   ;;  %s3712_s1 = inlined_call_operand.vmem [shape: bf16[16,128], index: 1, kind: input, shape index: {}]   ;;  %s3713_s2 = inlined_call_operand.vmem [shape: f32[16,1], index: 2, kind: input, shape index: {}]   ;;  %s3714_s3 = inlined_call_operand.vmem [shape: bf16[9,32,16], index: 3, kind: input, shape index: {}]   ;;  %s3715_s4 = inlined_call_operand.vmem [shape: f32[32,1], index: 4, kind: input, shape index: {}]   ;;  %s3716_s5 = inlined_call_operand.vmem [shape: f32[2,9,32,1], index: 5, kind: input, shape index: {}]   ;;  %s3717_s6 = inlined_call_operand.vmem [shape: bf16[9,16,32], index: 6, kind: input, shape index: {}]   ;;  %s3718_s7 = inlined_call_operand.vmem [shape: f32[16,1], index: 7, kind: input, shape index: {}]   ;;  %s3719_s8 = inlined_call_operand.vmem [shape: bf16[16,16], index: 8, kind: input, shape index: {}]   ;;  %s3720_s9 = inlined_call_operand.vmem [shape: f32[16,1], index: 9, kind: input, shape index: {}]   ;;  %s3721_s10 = inlined_call_operand.vmem [shape: bf16[9,1,16], index: 10, kind: input, shape index: {}]   ;;  %s3722_s11 = inlined_call_operand.vmem [shape: f32[2,16,16], index: 11, kind: output, shape index: {}]  }
   0x1 LB: > { %s2619_s18 = sadd.s32 4294967295, %s3141_s17   ;;  %p2623_p0 = scmp.ge.s32.totalorder %s3141_s17, 1  ;;  %s3141_s17 = sphi %s3214_s17, %s21_s17  }
   0x2   : > { %p347_p1 = scmp.lt.s32.totalorder %s3141_s17, 3 }
   0x4   : > { %p348_p2 = pnand %p2623_p0, %p347_p1 }
   0x5   : > { %p392_p3 = scmp.lt.s32.totalorder (!%p348_p2), %s2619_s18, 1  ;;  %v3225_v0 = vld [vmem:[%s3721_s10] sm:$0x1] (!%p348_p2)  ;;  %v549_v1 = vlaneseq (!%p348_p2)  ;;  %v3143_v2 = vmov (!%p348_p2), 0.0   ;;  %vm3144_vm0 = vmmov (!%p348_p2), 0   ;;  %vm535_vm1 = vcmask (!%p348_p2), 130048  }
   0x6   : > { %351 = sbr.rel (%p348_p2) target bundleno = 1393 (0x571), region = 64  ;;  %2859 = vmatprep.subr.bf16.mxu0 (!%p348_p2), %v3143_v2  ;;  %2875 = vmatprep.mubr.msk.bf16.mxu0 (!%p348_p2), %vm3144_vm0, %v3143_v2  ;;  %v547_v3 = vpack.i.b16 (!%p348_p2), %v3225_v0, %v3225_v0  ;;  %v3145_v5 = vmov (!%p348_p2), 0   ;;  %v426_v6 = vld [vmem:[%s3713_s2] sm:$0xff] (!%p348_p2)  ;;  %v427_v10 = vld [vmem:[%s3713_s2 + $0x8] sm:$0xff] (!%p348_p2)  ;;  %s3146_s16 = smov (!%p348_p2), 123   ;;  %vm608_vm2 = vcmask (!%p348_p2), 39936  }
   0x7   : > { %v550_v4 = vshrl.u32 (!%p348_p2), %v549_v1, 7  ;;  %3095 = vset.pattern.permute.xlu0 (!%p348_p2), %v3145_v5  ;;  %533 = vst [vmem:[#allocation2] sm:$0xff] (!%p348_p2), %v3145_v5  ;;  %534 = vst [vmem:[#allocation2 + $0x8] sm:$0xff] (!%p348_p2), %v3145_v5  ;;  %3096 = vset.pattern.permute.xlu1 (!%p348_p2), %v3145_v5  ;;  %v3240_v7 = vld [vmem:[%s3721_s10 + $0x2] sm:$0x1] (!%p348_p2)  ;;  %s3147_s19 = smov (!%p348_p2), 125  }
   0x8   : > { %1749 = vst [vmem:[#allocation3 + $0x8] sm:$0xff] (!%p348_p2), %v3145_v5  ;;  %1752 = vst [vmem:[#allocation3 + $0x20] sm:$0xff] (!%p348_p2), %v3145_v5  ;;  %430 = vperm.xlu0 (!%p348_p2), %3095, %v426_v6   ;;  %v3245_v8 = vld [vmem:[%s3721_s10 + $0x1] sm:$0x1] (!%p348_p2)  ;;  %v810_v11 = vpack.i.b16 (!%p348_p2), %v3240_v7, %v3240_v7  ;;  %v3265_v13 = vld [vmem:[%s3721_s10 + $0x3] sm:$0x1] (!%p348_p2) }
   0x9   : > { %v3248_v9 = vsub.s32 (!%p348_p2), 0, %v550_v4  ;;  %v674_v12 = vpack.i.b16 (!%p348_p2), %v3245_v8, %v3245_v8  ;;  %v946_v19 = vpack.i.b16 (!%p348_p2), %v3265_v13, %v3265_v13  ;;  %s3148_s20 = smov (!%p348_p2), 124   ;;  %s3149_s21 = smov (!%p348_p2), 127   ;;  %v3105_v27 = vld [vmem:[%s3712_s1] sm:$0xff] (!%p348_p2)   ;;  %v3343_v59 = vld [vmem:[%s3721_s10 + $0x8] sm:$0x1] (!%p348_p2) }
   0xa   : > { %v3301_v28 = vld [vmem:[%s3721_s10 + $0x5] sm:$0x1] (!%p348_p2)  ;;  %s3150_s26 = smov (!%p348_p2), 5   ;;  %v3318_v45 = vld [vmem:[%s3721_s10 + $0x7] sm:$0x1] (!%p348_p2)  ;;  %s3152_s15 = smov (!%p348_p2), 4   ;;  %v1594_v63 = vpack.i.b16 (!%p348_p2), %v3343_v59, %v3343_v59 }
   0xb   : > { %v552_v15 = vrot.slane (!%p348_p2), %v547_v3, %v3248_v9  ;;  %v815_v16 = vrot.slane (!%p348_p2), %v810_v11, %v3248_v9  ;;  %v679_v18 = vrot.slane (!%p348_p2), %v674_v12, %v3248_v9  ;;  %v951_v21 = vrot.slane (!%p348_p2), %v946_v19, %v3248_v9  ;;  %v3106_v42 = vld [vmem:[%s3714_s3] sm:$0xff] (!%p348_p2)   ;;  %s3153_s22 = smov (!%p348_p2), 3   ;;  %v3108_v12 = vld [vmem:[%s3714_s3 + $0x10] sm:$0xff] (!%p348_p2)  }
   0xc   : > { %435 = vperm.xlu0 (!%p348_p2), %3095, %v427_v10   ;;  %v1204_v29 = vpack.i.b16 (!%p348_p2), %v3301_v28, %v3301_v28  ;;  %2881 = vmatprep.mubr.msk.bf16.mxu1 (!%p348_p2), %vm535_vm1, %v3106_v42  ;;  %v3324_v47 = vld [vmem:[%s3721_s10 + $0x6] sm:$0x1] (!%p348_p2)  ;;  %v1464_v51 = vpack.i.b16 (!%p348_p2), %v3318_v45, %v3318_v45  ;;  %v1599_v3 = vrot.slane (!%p348_p2), %v1594_v63, %v3248_v9  ;;  %v3107_v10 = vld [vmem:[%s3714_s3 + $0x8] sm:$0xff] (!%p348_p2)   ;;  %vm702_vm3 = vcmask (!%p348_p2), 31744  }
   0xd   : > { %s3724_s18 = smov (!%p392_p3, %s2619_s18), 1  ;;  %554 = vrot.lane.b32.xlu1 %v552_v15, %s3146_s16  ;;  %v1334_v53 = vpack.i.b16 %v3324_v47, %v3324_v47  ;;  %vm838_vm4 = vcmask 23552   ;;  %vm974_vm5 = vcmask 7168   ;;  %vm1820_vm6 = vcmask 261120  }
   0xe   : > { %s2792_s27 = sshll.u32 %s3724_s18, 6  ;;  %v1209_v32 = vrot.slane %v1204_v29, %v3248_v9  ;;  %v1469_v54 = vrot.slane %v1464_v51, %v3248_v9  ;;  %s3075_s12 = smul.u32 288, %s3724_s18  ;;  %v3114_v51 = vld [vmem:[%s3714_s3 + $0x40] sm:$0xff]  }
   0xf   : > { %s3260_s13 = scalar_lea.vmem %s3711_s0, %s2792_s27  ;;  %s3151_s27 = smov 1   ;;  %v1339_v56 = vrot.slane %v1334_v53, %v3248_v9 }
  0x10   : > { %v3097_v14 = vld [vmem:[%s3260_s13] sm:$0xff]   ;;  %v3098_v17 = vld [vmem:[%s3260_s13 + $0x8] sm:$0xff]   ;;  %817 = vrot.lane.b32.xlu0 %v815_v16, %s3147_s19  ;;  %v3099_v20 = vld [vmem:[%s3260_s13 + $0x10] sm:$0xff]   ;;  %s3369_s23 = scalar_lea.vmem %s3716_s5, %s3075_s12  ;;  %s2793_s28 = sshll.u32 %s3724_s18, 4 }
  0x11   : > { %2860 = vmatpush3.bf16.msra.mxu0 %v3097_v14  ;;  %681 = vrot.lane.b32.xlu1 %v679_v18, %s3148_s20  ;;  %v3100_v22 = vld [vmem:[%s3260_s13 + $0x18] sm:$0xff]   ;;  %v3101_v23 = vld [vmem:[%s3260_s13 + $0x20] sm:$0xff]   ;;  %v3102_v24 = vld [vmem:[%s3260_s13 + $0x28] sm:$0xff]   ;;  %s406_s12 = scalar_lea.vmem %s3722_s11, %s2793_s28 }
  0x12   : > { %2861 = vmatprep.subr.bf16.mxu0 %v3143_v2  ;;  %v3103_v25 = vld [vmem:[%s3260_s13 + $0x30] sm:$0xff]   ;;  %v3104_v26 = vld [vmem:[%s3260_s13 + $0x38] sm:$0xff]   ;;  %v2716_v63 = vld [vmem:[%s3369_s23 + $0xc0] sm:$0xff] }
  0x15   : > { %2862 = vmatpush3.bf16.msra.mxu0 %v3098_v17  ;;  %953 = vrot.lane.b32.xlu1 %v951_v21, %s3149_s21 }
  0x16   : > { %2863 = vmatprep.subr.bf16.mxu0 %v3143_v2 }
  0x19   : > { %2864 = vmatpush3.bf16.msra.mxu0 %v3099_v20  ;;  %v559_v20 = vld [vmem:[%s3369_s23] sm:$0xff] }
  0x1a   : > { %2865 = vmatprep.subr.bf16.mxu0 %v3143_v2 }
  0x1d   : > { %2866 = vmatpush3.bf16.msra.mxu0 %v3100_v22 }
  0x1e   : > { %2867 = vmatprep.subr.bf16.mxu0 %v3143_v2 }
  0x21   : > { %2868 = vmatpush3.bf16.msra.mxu0 %v3101_v23  ;;  %v3109_v23 = vld [vmem:[%s3714_s3 + $0x18] sm:$0xff]  }
  0x22   : > { %2869 = vmatprep.subr.bf16.mxu0 %v3143_v2 }
  0x25   : > { %2870 = vmatpush3.bf16.msra.mxu0 %v3102_v24  ;;  %v2651_v24 = vld [vmem:[%s3369_s23 + $0x20] sm:$0xff] }
  0x26   : > { %2871 = vmatprep.subr.bf16.mxu0 %v3143_v2 }
  0x29   : > { %2872 = vmatpush3.bf16.msra.mxu0 %v3103_v25  ;;  %v3110_v25 = vld [vmem:[%s3714_s3 + $0x20] sm:$0xff]  }
  0x2a   : > { %2873 = vmatprep.subr.bf16.mxu0 %v3143_v2 }
  0x2d   : > { %2874 = vmatpush3.bf16.msra.mxu0 %v3104_v26 }
  0x2e   : > { %2933 = vmatprep.subr.bf16.mxu0 %v3143_v2 }
  0x30   : > { %2876 = vmatmul.mubr.bf16.vlgmr.msra.gmra.mrb[0].mxu0 %v3105_v27 }
  0x31   : > { %2937 = vmatprep.mubr.msk.bf16.mxu0 %vm3144_vm0, %v3143_v2 }
  0x7f   : > { %v555_v30 = vpop.permute.xlu1 %554 }
  0x80   : > { %v557_v31 = vmul.bf16 0, %v555_v30 }
  0x82   : > { %604 = vrot.lane.b32.xlu0 %v557_v31, %s3150_s26  ;;  %v3391_v31 = vld [vmem:[%s3721_s10 + $0x4] sm:$0x1] }
  0x83   : > { %v682_v44 = vpop.permute.xlu1 %681 }
  0x84   : > { %v684_v52 = vmul.bf16 0, %v682_v44 }
  0x86   : > { %1211 = vrot.lane.b32.xlu0 %v1209_v32, %s3151_s27 }
  0x87   : > { %v431_v33 = vpop.permute.xlu0 %430  ;;  %v954_v57 = vpop.permute.xlu1 %953 }
  0x88   : > { %v956_v62 = vmul.bf16 0, %v954_v57 }
  0x8b   : > { %v436_v36 = vpop.permute.xlu0 %435 }
  0x8f   : > { %v818_v48 = vpop.permute.xlu0 %817 }
  0x90   : > { %v820_v50 = vmul.bf16 0, %v818_v48 }
  0xf4   : > { %v605_v55 = vpop.permute.xlu0 %604 }
  0xf8   : > { %v1212_v61 = vpop.permute.xlu0 %1211 }
 0x103   : > { %v526_v34 = vpop.f32.mrb[0].mxu0 }
 0x104   : > { %v2877_v35 = vpop.f32.mrb[1].mxu0  ;;  %v527_v38 = vadd.f32 %v526_v34, %v431_v33  ;;  %v1082_v34 = vpack.i.b16 %v3391_v31, %v3391_v31 }
 0x105   : > { %v529_v37 = vpop.f32.mrb[2].mxu0  ;;  %v561_v35 = vld [vmem:[%s3369_s23 + $0x10] sm:$0xff] }
 0x106   : > { %v530_v39 = vadd.f32 %v529_v37, %v436_v36  ;;  %v2878_v40 = vpop.f32.mrb[3].mxu0  ;;  %v560_v36 = vld [vmem:[%s3369_s23 + $0x8] sm:$0xff] }
 0x107   : > { %v3111_v37 = vld [vmem:[%s3714_s3 + $0x28] sm:$0xff]   ;;  %v3112_v40 = vld [vmem:[%s3714_s3 + $0x30] sm:$0xff]  }
 0x108   : > { %v537_v41 = vpack.c.bf16 %v530_v39, %v527_v38  ;;  %v1087_v38 = vrot.slane %v1082_v34, %v3248_v9  ;;  %v2653_v39 = vld [vmem:[%s3369_s23 + $0x30] sm:$0xff] }
 0x10a   : > { %538 = vst.msk [vmem:[#allocation2 + $0x8] sm:$0xff] %vm535_vm1, %v537_v41  ;;  %v2652_v41 = vld [vmem:[%s3369_s23 + $0x28] sm:$0xff] }
 0x111   : > { %v3313_v43 = vld [vmem:[#allocation2 + $0x8] sm:$0xff] }
 0x112   : > { %v685_v46 = vmul.bf16 %v682_v44, %v3313_v43  ;;  %v558_v49 = vmul.bf16 %v555_v30, %v3313_v43  ;;  %v957_v58 = vmul.bf16 %v954_v57, %v3313_v43  ;;  %v821_v60 = vmul.bf16 %v818_v48, %v3313_v43  ;;  %v2664_v30 = vld [vmem:[%s3369_s23 + $0x40] sm:$0xff]  ;;  %v2666_v48 = vld [vmem:[%s3369_s23 + $0x50] sm:$0xff]  ;;  %v2667_v57 = vld [vmem:[%s3369_s23 + $0x58] sm:$0xff] }
 0x113   : > { %v1214_v1 = vmul.bf16 %v1212_v61, %v3313_v43  ;;  %v1088_v42 = vmul.bf16 %v1087_v38, %v3313_v43  ;;  %v2677_v44 = vld [vmem:[%s3369_s23 + $0x60] sm:$0xff]  ;;  %v3116_v61 = vld [vmem:[%s3714_s3 + $0x50] sm:$0xff]  }
 0x114   : > { %700 = vrot.lane.b32.xlu0 %v685_v46, %s3152_s15  ;;  %606 = vrot.lane.b32.xlu1 %v558_v49, %s3150_s26  ;;  %v2665_v46 = vld [vmem:[%s3369_s23 + $0x48] sm:$0xff]  ;;  %v562_v49 = vld [vmem:[%s3369_s23 + $0x18] sm:$0xff] }
 0x115   : > { %v1762_v38 = vld [vmem:[%s3721_s10] sm:$0x1] }
 0x118   : > { %834 = vrot.lane.b32.xlu0 %v820_v50, %s3153_s22  ;;  %698 = vrot.lane.b32.xlu1 %v684_v52, %s3152_s15  ;;  %v2690_v50 = vld [vmem:[%s3369_s23 + $0x80] sm:$0xff]  ;;  %v2654_v52 = vld [vmem:[%s3369_s23 + $0x38] sm:$0xff] }
 0x11c   : > { %1471 = vrot.lane.b32.xlu0 %v1469_v54, %s3152_s15  ;;  %1341 = vrot.lane.b32.xlu1 %v1339_v56, %s3153_s22  ;;  %v2679_v54 = vld [vmem:[%s3369_s23 + $0x70] sm:$0xff]  ;;  %v2703_v56 = vld [vmem:[%s3369_s23 + $0xa0] sm:$0xff] }
 0x120   : > { %972 = vrot.lane.b32.xlu0 %v957_v58, %s3151_s27  ;;  %836 = vrot.lane.b32.xlu1 %v821_v60, %s3153_s22  ;;  %v3115_v58 = vld [vmem:[%s3714_s3 + $0x48] sm:$0xff]   ;;  %v2692_v60 = vld [vmem:[%s3369_s23 + $0x90] sm:$0xff] }
 0x124   : > { %1226 = vrot.lane.b32.xlu0 %v1214_v1, %s3149_s21  ;;  %970 = vrot.lane.b32.xlu1 %v956_v62, %s3151_s27  ;;  %v2691_v62 = vld [vmem:[%s3369_s23 + $0x88] sm:$0xff]  ;;  %v2680_v1 = vld [vmem:[%s3369_s23 + $0x78] sm:$0xff] }
 0x128   : > { %1601 = vrot.lane.b32.xlu1 %v1599_v3, %s3150_s26  ;;  %v2705_v3 = vld [vmem:[%s3369_s23 + $0xb0] sm:$0xff] }
 0x186   : > { %v701_v4 = vpop.permute.xlu0 %700  ;;  %v607_v5 = vpop.permute.xlu1 %606 }
 0x187   : > { %v609_v6 = vsel %vm608_vm2, %v605_v55, %v607_v5  ;;  %v2678_v55 = vld [vmem:[%s3369_s23 + $0x68] sm:$0xff]  ;;  %v3117_v5 = vld [vmem:[%s3714_s3 + $0x58] sm:$0xff]  }
 0x188   : > { %2879 = vmatprep.subr.bf16.mxu1 %v609_v6 }
 0x189   : > { %2880 = vmatpush3.bf16.msra.mxu1 %v609_v6  ;;  %v2729_v6 = vld [vmem:[%s3369_s23 + $0xe0] sm:$0xff] }
 0x18a   : > { %v835_v11 = vpop.permute.xlu0 %834  ;;  %v699_v14 = vpop.permute.xlu1 %698 }
 0x18b   : > { %v703_v15 = vsel %vm702_vm3, %v699_v14, %v701_v4  ;;  %v2704_v4 = vld [vmem:[%s3369_s23 + $0xa8] sm:$0xff] }
 0x18c   : > { %2882 = vmatmul.mubr.msk.bf16.vlgmr.msra.gmra.mrb[0].mxu1 %vm535_vm1, %v3107_v10  ;;  %2885 = vmatprep.subr.bf16.mxu1 %v703_v15  ;;  %v3118_v10 = vld [vmem:[%s3714_s3 + $0x60] sm:$0xff]   ;;  %v2717_v14 = vld [vmem:[%s3369_s23 + $0xc8] sm:$0xff] }
 0x18d   : > { %2886 = vmatpush3.bf16.msra.mxu1 %v703_v15  ;;  %2887 = vmatprep.mubr.msk.bf16.mxu1 %vm535_vm1, %v3108_v12  ;;  %v2718_v12 = vld [vmem:[%s3369_s23 + $0xd0] sm:$0xff] }
 0x18e   : > { %v1472_v16 = vpop.permute.xlu0 %1471  ;;  %v1342_v18 = vpop.permute.xlu1 %1341  ;;  %v2731_v15 = vld [vmem:[%s3369_s23 + $0xf0] sm:$0xff] }
 0x18f   : > { %v1474_v17 = vmul.bf16 %v1472_v16, %v3313_v43  ;;  %v1344_v19 = vmul.bf16 %v1342_v18, %v3313_v43  ;;  %v2706_v16 = vld [vmem:[%s3369_s23 + $0xb8] sm:$0xff]  ;;  %v2730_v18 = vld [vmem:[%s3369_s23 + $0xe8] sm:$0xff] }
 0x191   : > { %1486 = vrot.lane.b32.xlu0 %v1474_v17, %s3148_s20  ;;  %1356 = vrot.lane.b32.xlu1 %v1344_v19, %s3147_s19  ;;  %v2742_v17 = vld [vmem:[%s3369_s23 + $0x100] sm:$0xff]  ;;  %v2744_v19 = vld [vmem:[%s3369_s23 + $0x110] sm:$0xff] }
 0x192   : > { %v837_v21 = vpop.permute.xlu1 %836  ;;  %v973_v26 = vpop.permute.xlu0 %972 }
 0x193   : > { %v839_v22 = vsel %vm838_vm4, %v835_v11, %v837_v21  ;;  %v2693_v11 = vld [vmem:[%s3369_s23 + $0x98] sm:$0xff]  ;;  %v1716_v21 = vld [vmem:[%s3715_s4] sm:$0xff] }
 0x194   : > { %2891 = vmatprep.subr.bf16.mxu1 %v839_v22 }
 0x195   : > { %566 = vperm.xlu0 %3095, %v559_v20   ;;  %v2719_v20 = vld [vmem:[%s3369_s23 + $0xd8] sm:$0xff] }
 0x196   : > { %v971_v27 = vpop.permute.xlu1 %970  ;;  %v1227_v53 = vpop.permute.xlu0 %1226 }
 0x197   : > { %v975_v29 = vsel %vm974_vm5, %v971_v27, %v973_v26  ;;  %v2753_v26 = vld [vmem:[%s3721_s10 + $0x2] sm:$0x1] }
 0x198   : > { %2888 = vmatmul.mubr.msk.bf16.vlgmr.msra.gmra.mrb[0].mxu1 %vm535_vm1, %v3109_v23  ;;  %v1718_v23 = vld [vmem:[%s3715_s4 + $0x10] sm:$0xff] }
 0x199   : > { %772 = vperm.xlu0 %3095, %v2651_v24   ;;  %2892 = vmatpush3.bf16.msra.mxu1 %v839_v22  ;;  %v2732_v22 = vld [vmem:[%s3369_s23 + $0xf8] sm:$0xff]  ;;  %v2743_v24 = vld [vmem:[%s3369_s23 + $0x108] sm:$0xff] }
 0x19a   : > { %2893 = vmatprep.mubr.msk.bf16.mxu1 %vm535_vm1, %v3110_v25  ;;  %2897 = vmatprep.subr.bf16.mxu1 %v975_v29  ;;  %v1602_v32 = vpop.permute.xlu1 %1601  ;;  %v2746_v25 = vld [vmem:[%s3721_s10 + $0x1] sm:$0x1] }
 0x19b   : > { %v1604_v33 = vmul.bf16 %v1602_v32, %v3313_v43  ;;  %v3113_v43 = vld [vmem:[%s3714_s3 + $0x38] sm:$0xff]   ;;  %v1785_v27 = vpack.i.b16 %v2746_v25, %v2746_v25 }
 0x19d   : > { %908 = vperm.xlu0 %3095, %v2664_v30   ;;  %1616 = vrot.lane.b32.xlu1 %v1604_v33, %s3146_s16  ;;  %v2768_v30 = vld [vmem:[%s3721_s10 + $0x5] sm:$0x1]  ;;  %v1790_v32 = vrot.slane %v1785_v27, %v3248_v9  ;;  %v2745_v33 = vld [vmem:[%s3369_s23 + $0x118] sm:$0xff] }
 0x1a1   : > { %576 = vperm.xlu0 %3095, %v561_v35   ;;  %571 = vperm.xlu1 %3096, %v560_v36   ;;  %v2171_v35 = vpack.i.b16 %v2768_v30, %v2768_v30  ;;  %v2778_v36 = vld [vmem:[%s3721_s10 + $0x7] sm:$0x1] }
 0x1a4   : > { %2894 = vmatmul.mubr.msk.bf16.vlgmr.msra.gmra.mrb[0].mxu1 %vm535_vm1, %v3111_v37  ;;  %v1717_v37 = vld [vmem:[%s3715_s4 + $0x8] sm:$0xff] }
 0x1a5   : > { %782 = vperm.xlu0 %3095, %v2653_v39   ;;  %2898 = vmatpush3.bf16.msra.mxu1 %v975_v29  ;;  %v1935_v29 = vpack.i.b16 %v2753_v26, %v2753_v26  ;;  %v2176_v39 = vrot.slane %v2171_v35, %v3248_v9 }
 0x1a6   : > { %2899 = vmatprep.mubr.msk.bf16.mxu1 %vm535_vm1, %v3112_v40  ;;  %2903 = vmatprep.subr.bf16.mxu1 %v1088_v42  ;;  %v2323_v40 = vpack.i.b16 %v2778_v36, %v2778_v36 }
 0x1a7   : > { %777 = vperm.xlu1 %3096, %v2652_v41   ;;  %v1940_v34 = vrot.slane %v1935_v29, %v3248_v9  ;;  %v1766_v41 = vpack.i.b16 %v1762_v38, %v1762_v38 }
 0x1a9   : > { %1044 = vperm.xlu0 %3095, %v2677_v44   ;;  %v2758_v44 = vld [vmem:[%s3721_s10 + $0x3] sm:$0x1] }
 0x1ab   : > { %913 = vperm.xlu1 %3096, %v2665_v46   ;;  %v2328_v46 = vrot.slane %v2323_v40, %v3248_v9 }
 0x1ad   : > { %918 = vperm.xlu0 %3095, %v2666_v48   ;;  %v1771_v48 = vrot.slane %v1766_v41, %v3248_v9 }
 0x1af   : > { %581 = vperm.xlu1 %3096, %v562_v49   ;;  %v2021_v49 = vpack.i.b16 %v2758_v44, %v2758_v44 }
 0x1b0   : > { %2900 = vmatmul.mubr.msk.bf16.vlgmr.msra.gmra.mrb[0].mxu1 %vm535_vm1, %v3113_v43  ;;  %v2773_v43 = vld [vmem:[%s3721_s10 + $0x6] sm:$0x1] }
 0x1b1   : > { %1166 = vperm.xlu0 %3095, %v2690_v50   ;;  %2904 = vmatpush3.bf16.msra.mxu1 %v1088_v42  ;;  %v1719_v42 = vld [vmem:[%s3715_s4 + $0x18] sm:$0xff]  ;;  %v2026_v50 = vrot.slane %v2021_v49, %v3248_v9 }
 0x1b2   : > { %2905 = vmatprep.mubr.msk.bf16.mxu1 %vm535_vm1, %v3114_v51  ;;  %2909 = vmatprep.subr.bf16.mxu1 %v1227_v53  ;;  %v2247_v51 = vpack.i.b16 %v2773_v43, %v2773_v43 }
 0x1b3   : > { %787 = vperm.xlu1 %3096, %v2654_v52   ;;  %v2783_v52 = vld [vmem:[%s3721_s10 + $0x8] sm:$0x1] }
 0x1b5   : > { %1054 = vperm.xlu0 %3095, %v2679_v54   ;;  %v2399_v54 = vpack.i.b16 %v2783_v52, %v2783_v52 }
 0x1b7   : > { %1049 = vperm.xlu1 %3096, %v2678_v55   ;;  %v2404_v55 = vrot.slane %v2399_v54, %v3248_v9 }
 0x1b9   : > { %1296 = vperm.xlu0 %3095, %v2703_v56  }
 0x1bb   : > { %923 = vperm.xlu1 %3096, %v2667_v57   ;;  %v3119_v57 = vld [vmem:[%s3714_s3 + $0x68] sm:$0xff]  }
 0x1bc   : > { %2906 = vmatmul.mubr.msk.bf16.vlgmr.msra.gmra.mrb[0].mxu1 %vm535_vm1, %v3115_v58 }
 0x1bd   : > { %1176 = vperm.xlu0 %3095, %v2692_v60   ;;  %2910 = vmatpush3.bf16.msra.mxu1 %v1227_v53  ;;  %v2252_v53 = vrot.slane %v2247_v51, %v3248_v9  ;;  %v3120_v60 = vld [vmem:[%s3714_s3 + $0x70] sm:$0xff]  }
 0x1be   : > { %2911 = vmatprep.mubr.msk.bf16.mxu1 %vm535_vm1, %v3116_v61  ;;  %v563_v61 = vunpack.c.l.bf16 %v3225_v0 }
 0x1bf   : > { %1171 = vperm.xlu1 %3096, %v2691_v62  }
 0x1c1   : > { %1426 = vperm.xlu0 %3095, %v2716_v63   ;;  %v587_v63 = vrot.slane %v563_v61, %v3248_v9 }
 0x1c3   : > { %1059 = vperm.xlu1 %3096, %v2680_v1   ;;  %v769_v1 = vunpack.c.l.bf16 %v3245_v8 }
 0x1c5   : > { %1306 = vperm.xlu0 %3095, %v2705_v3   ;;  %v3121_v3 = vld [vmem:[%s3714_s3 + $0x78] sm:$0xff]   ;;  %v793_v0 = vrot.slane %v769_v1, %v3248_v9 }
 0x1c7   : > { %1301 = vperm.xlu1 %3096, %v2704_v4   ;;  %v3122_v4 = vld [vmem:[%s3714_s3 + $0x80] sm:$0xff]  }
 0x1c8   : > { %2912 = vmatmul.mubr.msk.bf16.vlgmr.msra.gmra.mrb[0].mxu1 %vm535_vm1, %v3117_v5 }
 0x1c9   : > { %1556 = vperm.xlu0 %3095, %v2729_v6   ;;  %2917 = vmatprep.mubr.msk.bf16.mxu1 %vm535_vm1, %v3118_v10  ;;  %v905_v6 = vunpack.c.l.bf16 %v3240_v7  ;;  %v3123_v7 = vld [vmem:[%s3714_s3 + $0x88] sm:$0xff]  }
 0x1cb   : > { %1181 = vperm.xlu1 %3096, %v2693_v11  }
 0x1cd   : > { %1436 = vperm.xlu0 %3095, %v2718_v12   ;;  %v929_v12 = vrot.slane %v905_v6, %v3248_v9 }
 0x1cf   : > { %1431 = vperm.xlu1 %3096, %v2717_v14  }
 0x1d1   : > { %1566 = vperm.xlu0 %3095, %v2731_v15  }
 0x1d3   : > { %1311 = vperm.xlu1 %3096, %v2706_v16  }
 0x1d5   : > { %1686 = vperm.xlu0 %3095, %v2742_v17  }
 0x1d7   : > { %1561 = vperm.xlu1 %3096, %v2730_v18  }
 0x1d9   : > { %1696 = vperm.xlu0 %3095, %v2744_v19   ;;  %v1041_v19 = vunpack.c.l.bf16 %v3265_v13 }
 0x1db   : > { %1441 = vperm.xlu1 %3096, %v2719_v20   ;;  %v1065_v25 = vrot.slane %v1041_v19, %v3248_v9 }
 0x1dd   : > { %1722 = vperm.xlu0 %3095, %v1716_v21  }
 0x1df   : > { %1571 = vperm.xlu1 %3096, %v2732_v22  }
 0x1e1   : > { %1732 = vperm.xlu0 %3095, %v1718_v23  }
 0x1e3   : > { %1691 = vperm.xlu1 %3096, %v2743_v24  }
 0x1e5   : > { %1792 = vrot.lane.b32.xlu0 %v1790_v32, %s3148_s20  ;;  %v1163_v32 = vunpack.c.l.bf16 %v3391_v31 }
 0x1e7   : > { %1701 = vperm.xlu1 %3096, %v2745_v33  }
 0x1e9   : > { %1942 = vrot.lane.b32.xlu0 %v1940_v34, %s3147_s19 }
 0x1eb   : > { %1727 = vperm.xlu1 %3096, %v1717_v37  }
 0x1ed   : > { %2178 = vrot.lane.b32.xlu0 %v2176_v39, %s3151_s27  ;;  %v1187_v39 = vrot.slane %v1163_v32, %v3248_v9 }
 0x1ef   : > { %1737 = vperm.xlu1 %3096, %v1719_v42  }
 0x1f1   : > { %2330 = vrot.lane.b32.xlu0 %v2328_v46, %s3152_s15 }
 0x1f3   : > { %1773 = vrot.lane.b32.xlu1 %v1771_v48, %s3146_s16  ;;  %v1293_v48 = vunpack.c.l.bf16 %v3301_v28 }
 0x1f7   : > { %2028 = vrot.lane.b32.xlu1 %v2026_v50, %s3149_s21 }
 0x1fb   : > { %2254 = vrot.lane.b32.xlu1 %v2252_v53, %s3153_s22  ;;  %v1317_v53 = vrot.slane %v1293_v48, %v3248_v9 }
 0x1ff   : > { %2406 = vrot.lane.b32.xlu1 %v2404_v55, %s3150_s26 }
 0x203   : > { %v1357_v56 = vpop.permute.xlu1 %1356  ;;  %v1487_v58 = vpop.permute.xlu0 %1486 }
 0x204   : > { %2915 = vmatprep.subr.bf16.mxu1 %v1357_v56 }
 0x205   : > { %2916 = vmatpush3.bf16.msra.mxu1 %v1357_v56 }
 0x206   : > { %2921 = vmatprep.subr.bf16.mxu1 %v1487_v58 }
 0x208   : > { %2918 = vmatmul.mubr.msk.bf16.vlgmr.msra.gmra.mrb[0].mxu1 %vm535_vm1, %v3119_v57 }
 0x209   : > { %2922 = vmatpush3.bf16.msra.mxu1 %v1487_v58  ;;  %2923 = vmatprep.mubr.msk.bf16.mxu1 %vm535_vm1, %v3120_v60  ;;  %v1423_v60 = vunpack.c.l.bf16 %v3324_v47 }
 0x20f   : > { %v1617_v62 = vpop.permute.xlu1 %1616 }
 0x210   : > { %2927 = vmatprep.subr.bf16.mxu1 %v1617_v62 }
 0x214   : > { %v567_v5 = vpop.permute.xlu0 %566  ;;  %2924 = vmatmul.mubr.msk.bf16.vlgmr.msra.gmra.mrb[0].mxu1 %vm535_vm1, %v3121_v3 }
 0x215   : > { %v588_v10 = vmul.f32 %v587_v63, %v567_v5  ;;  %2928 = vmatpush3.bf16.msra.mxu1 %v1617_v62  ;;  %2929 = vmatprep.mubr.msk.bf16.mxu1 %vm535_vm1, %v3122_v4  ;;  %v1447_v5 = vrot.slane %v1423_v60, %v3248_v9 }
 0x216   : > { %2973 = vmatprep.subr.bf16.mxu1 %v3143_v2 }
 0x218   : > { %v773_v8 = vpop.permute.xlu0 %772 }
 0x219   : > { %v794_v11 = vmul.f32 %v793_v0, %v773_v8 }
 0x21b   : > { %v3019_v14 = vadd.f32 %v794_v11, %v588_v10 }
 0x21c   : > { %v909_v15 = vpop.permute.xlu0 %908 }
 0x21d   : > { %v930_v16 = vmul.f32 %v929_v12, %v909_v15 }
 0x21f   : > { %v3020_v17 = vadd.f32 %v3019_v14, %v930_v16  ;;  %v1553_v14 = vunpack.c.l.bf16 %v3318_v45 }
 0x220   : > { %v577_v18 = vpop.permute.xlu0 %576  ;;  %2930 = vmatmul.mubr.msk.bf16.vlgmr.msra.gmra.mrb[0].mxu1 %vm535_vm1, %v3123_v7  ;;  %v572_v21 = vpop.permute.xlu1 %571 }
 0x221   : > { %v590_v20 = vmul.f32 %v587_v63, %v577_v18  ;;  %v589_v22 = vmul.f32 %v587_v63, %v572_v21  ;;  %2977 = vmatprep.mubr.msk.bf16.mxu1 %vm3144_vm0, %v3143_v2 }
 0x224   : > { %v783_v23 = vpop.permute.xlu0 %782 }
 0x225   : > { %v796_v24 = vmul.f32 %v793_v0, %v783_v23 }
 0x226   : > { %v778_v26 = vpop.permute.xlu1 %777 }
 0x227   : > { %v3011_v27 = vadd.f32 %v796_v24, %v590_v20  ;;  %v795_v29 = vmul.f32 %v793_v0, %v778_v26 }
 0x228   : > { %v1045_v30 = vpop.permute.xlu0 %1044 }
 0x229   : > { %v1066_v33 = vmul.f32 %v1065_v25, %v1045_v30  ;;  %v3035_v13 = vadd.f32 %v795_v29, %v589_v22 }
 0x22a   : > { %v914_v34 = vpop.permute.xlu1 %913 }
 0x22b   : > { %v3021_v35 = vadd.f32 %v3020_v17, %v1066_v33  ;;  %v931_v36 = vmul.f32 %v929_v12, %v914_v34  ;;  %v1683_v33 = vunpack.c.l.bf16 %v3343_v59 }
 0x22c   : > { %v919_v37 = vpop.permute.xlu0 %918 }
 0x22d   : > { %v932_v38 = vmul.f32 %v929_v12, %v919_v37  ;;  %v3036_v40 = vadd.f32 %v3035_v13, %v931_v36 }
 0x22e   : > { %v582_v41 = vpop.permute.xlu1 %581 }
 0x22f   : > { %v3012_v42 = vadd.f32 %v3011_v27, %v932_v38  ;;  %v591_v44 = vmul.f32 %v587_v63, %v582_v41 }
 0x230   : > { %v1167_v46 = vpop.permute.xlu0 %1166 }
 0x231   : > { %v1188_v49 = vmul.f32 %v1187_v39, %v1167_v46 }
 0x232   : > { %v788_v43 = vpop.permute.xlu1 %787 }
 0x233   : > { %v3022_v50 = vadd.f32 %v3021_v35, %v1188_v49  ;;  %v797_v31 = vmul.f32 %v793_v0, %v788_v43 }
 0x234   : > { %v1055_v51 = vpop.permute.xlu0 %1054 }
 0x235   : > { %v1068_v52 = vmul.f32 %v1065_v25, %v1055_v51  ;;  %v3027_v54 = vadd.f32 %v797_v31, %v591_v44 }
 0x236   : > { %v1050_v55 = vpop.permute.xlu1 %1049 }
 0x237   : > { %v3013_v56 = vadd.f32 %v3012_v42, %v1068_v52  ;;  %v1067_v57 = vmul.f32 %v1065_v25, %v1050_v55 }
 0x238   : > { %v1297_v58 = vpop.permute.xlu0 %1296 }
 0x239   : > { %v1318_v61 = vmul.f32 %v1317_v53, %v1297_v58  ;;  %v3037_v62 = vadd.f32 %v3036_v40, %v1067_v57  ;;  %v1707_v40 = vrot.slane %v1683_v33, %v3248_v9 }
 0x23a   : > { %v924_v63 = vpop.permute.xlu1 %923 }
 0x23b   : > { %v3023_v1 = vadd.f32 %v3022_v50, %v1318_v61  ;;  %v933_v28 = vmul.f32 %v929_v12, %v924_v63  ;;  %v1577_v12 = vrot.slane %v1553_v14, %v3248_v9 }
 0x23c   : > { %v1177_v3 = vpop.permute.xlu0 %1176 }
 0x23d   : > { %v1190_v4 = vmul.f32 %v1187_v39, %v1177_v3  ;;  %v3028_v6 = vadd.f32 %v3027_v54, %v933_v28 }
 0x23e   : > { %v1172_v10 = vpop.permute.xlu1 %1171 }
 0x23f   : > { %v3014_v0 = vadd.f32 %v3013_v56, %v1190_v4  ;;  %v1189_v8 = vmul.f32 %v1187_v39, %v1172_v10 }
 0x240   : > { %v1427_v11 = vpop.permute.xlu0 %1426 }
 0x241   : > { %v1448_v15 = vmul.f32 %v1447_v5, %v1427_v11  ;;  %v3038_v16 = vadd.f32 %v3037_v62, %v1189_v8 }
 0x242   : > { %v1060_v7 = vpop.permute.xlu1 %1059 }
 0x243   : > { %v3024_v47 = vadd.f32 %v3023_v1, %v1448_v15  ;;  %v1069_v17 = vmul.f32 %v1065_v25, %v1060_v7 }
 0x244   : > { %v1307_v18 = vpop.permute.xlu0 %1306 }
 0x245   : > { %v1320_v19 = vmul.f32 %v1317_v53, %v1307_v18  ;;  %v3029_v20 = vadd.f32 %v3028_v6, %v1069_v17 }
 0x246   : > { %v1302_v21 = vpop.permute.xlu1 %1301 }
 0x247   : > { %v3015_v22 = vadd.f32 %v3014_v0, %v1320_v19  ;;  %v1319_v23 = vmul.f32 %v1317_v53, %v1302_v21 }
 0x248   : > { %v1557_v24 = vpop.permute.xlu0 %1556 }
 0x249   : > { %v1578_v26 = vmul.f32 %v1577_v12, %v1557_v24  ;;  %v3039_v27 = vadd.f32 %v3038_v16, %v1319_v23 }
 0x24a   : > { %v1182_v29 = vpop.permute.xlu1 %1181 }
 0x24b   : > { %v1191_v30 = vmul.f32 %v1187_v39, %v1182_v29  ;;  %v3025_v32 = vadd.f32 %v3024_v47, %v1578_v26 }
 0x24c   : > { %v1437_v45 = vpop.permute.xlu0 %1436 }
 0x24d   : > { %v1450_v13 = vmul.f32 %v1447_v5, %v1437_v45  ;;  %v3030_v34 = vadd.f32 %v3029_v20, %v1191_v30 }
 0x24e   : > { %v1432_v25 = vpop.permute.xlu1 %1431 }
 0x24f   : > { %v3016_v35 = vadd.f32 %v3015_v22, %v1450_v13  ;;  %v1449_v36 = vmul.f32 %v1447_v5, %v1432_v25 }
 0x250   : > { %v1567_v37 = vpop.permute.xlu0 %1566 }
 0x251   : > { %v1580_v38 = vmul.f32 %v1577_v12, %v1567_v37  ;;  %v3040_v41 = vadd.f32 %v3039_v27, %v1449_v36 }
 0x252   : > { %v1312_v42 = vpop.permute.xlu1 %1311 }
 0x253   : > { %v1321_v44 = vmul.f32 %v1317_v53, %v1312_v42  ;;  %v3017_v46 = vadd.f32 %v3016_v35, %v1580_v38 }
 0x254   : > { %v1687_v48 = vpop.permute.xlu0 %1686 }
 0x255   : > { %v1708_v49 = vmul.f32 %v1707_v40, %v1687_v48  ;;  %v3031_v39 = vadd.f32 %v3030_v34, %v1321_v44 }
 0x256   : > { %v1562_v43 = vpop.permute.xlu1 %1561 }
 0x257   : > { %v1579_v50 = vmul.f32 %v1577_v12, %v1562_v43  ;;  %v2470_v43 = vld [vmem:[%s3718_s7] sm:$0xff] }
 0x258   : > { %v1697_v31 = vpop.permute.xlu0 %1696 }
 0x259   : > { %v1710_v59 = vmul.f32 %v1707_v40, %v1697_v31  ;;  %v3041_v51 = vadd.f32 %v3040_v41, %v1579_v50  ;;  %v2489_v31 = vld [vmem:[%s3720_s9] sm:$0xff] }
 0x25a   : > { %v1442_v52 = vpop.permute.xlu1 %1441 }
 0x25b   : > { %v1451_v54 = vmul.f32 %v1447_v5, %v1442_v52  ;;  %v3134_v5 = vld [vmem:[#allocation2] sm:$0xff] }
 0x25c   : > { %v1723_v55 = vpop.permute.xlu0 %1722 }
 0x25d   : > { %v3032_v56 = vadd.f32 %v3031_v39, %v1451_v54 }
 0x25e   : > { %v1572_v57 = vpop.permute.xlu1 %1571 }
 0x25f   : > { %v1581_v58 = vmul.f32 %v1577_v12, %v1572_v57 }
 0x260   : > { %v1733_v60 = vpop.permute.xlu0 %1732 }
 0x261   : > { %v3033_v61 = vadd.f32 %v3032_v56, %v1581_v58 }
 0x262   : > { %v1692_v62 = vpop.permute.xlu1 %1691 }
 0x263   : > { %v1709_v63 = vmul.f32 %v1707_v40, %v1692_v62  ;;  %v2490_v62 = vld [vmem:[%s3720_s9 + $0x8] sm:$0xff] }
 0x264   : > { %v1793_v53 = vpop.permute.xlu0 %1792 }
 0x265   : > { %v1795_v1 = vmul.bf16 0, %v1793_v53 }
 0x266   : > { %v1702_v28 = vpop.permute.xlu1 %1701 }
 0x267   : > { %v1711_v3 = vmul.f32 %v1707_v40, %v1702_v28  ;;  %1808 = vrot.lane.b32.xlu0 %v1795_v1, %s3152_s15 }
 0x268   : > { %v1943_v8 = vpop.permute.xlu0 %1942 }
 0x269   : > { %v1945_v11 = vmul.bf16 %v3134_v5, %v1943_v8 }
 0x26a   : > { %v1728_v4 = vpop.permute.xlu1 %1727 }
 0x26b   : > { %1812 = vrot.lane.b32.xlu0 %v1795_v1, %s3152_s15 }
 0x26e   : > { %v1738_v6 = vpop.permute.xlu1 %1737 }
 0x272   : > { %v1774_v10 = vpop.permute.xlu1 %1773 }
 0x273   : > { %v1776_v0 = vmul.bf16 %v3134_v5, %v1774_v10 }
 0x275   : > { %1874 = vrot.lane.b32.xlu0 %v1776_v0, %s3150_s26 }
 0x276   : > { %v2029_v14 = vpop.permute.xlu1 %2028 }
 0x277   : > { %v2031_v15 = vmul.bf16 %v3134_v5, %v2029_v14 }
 0x279   : > { %1878 = vrot.lane.b32.xlu0 %v1776_v0, %s3150_s26 }
 0x27a   : > { %v2255_v54 = vpop.permute.xlu1 %2254 }
 0x27d   : > { %1958 = vrot.lane.b32.xlu0 %v1945_v11, %s3153_s22 }
 0x27e   : > { %v2407_v57 = vpop.permute.xlu1 %2406 }
 0x281   : > { %1962 = vrot.lane.b32.xlu0 %v1945_v11, %s3153_s22 }
 0x285   : > { %2044 = vrot.lane.b32.xlu0 %v2031_v15, %s3151_s27 }
 0x289   : > { %2048 = vrot.lane.b32.xlu0 %v2031_v15, %s3151_s27 }
 0x2f3   : > { %v2931_v16 = vpop.f32.mrb[0].mxu1 }
 0x2f4   : > { %v3018_v7 = vadd.f32 %v3017_v46, %v2931_v16  ;;  %v1659_v47 = vpop.f32.mrb[1].mxu1 }
 0x2f5   : > { %v3026_v17 = vadd.f32 %v3025_v32, %v1659_v47  ;;  %v2932_v18 = vpop.f32.mrb[2].mxu1  ;;  %v2179_v32 = vpop.permute.xlu0 %2178 }
 0x2f6   : > { %v1714_v19 = vadd.f32 %v3018_v7, %v1710_v59  ;;  %v3034_v12 = vadd.f32 %v3033_v61, %v2932_v18  ;;  %v1662_v20 = vpop.f32.mrb[3].mxu1  ;;  %v2471_v61 = vld [vmem:[%s3718_s7 + $0x8] sm:$0xff] }
 0x2f7   : > { %v1712_v21 = vadd.f32 %v3026_v17, %v1708_v49  ;;  %v3042_v22 = vadd.f32 %v3041_v51, %v1662_v20  ;;  %v3124_v7 = vld [vmem:[%s3717_s6 + $0x8] sm:$0xff]  }
 0x2f8   : > { %v1742_v23 = vadd.f32 %v1733_v60, %v1714_v19  ;;  %v1715_v24 = vadd.f32 %v3034_v12, %v1711_v3  ;;  %v3131_v12 = vld [vmem:[%s3717_s6 + $0x38] sm:$0xff]  }
 0x2f9   : > { %v1740_v26 = vadd.f32 %v1723_v55, %v1712_v21  ;;  %v1713_v27 = vadd.f32 %v3042_v22, %v1709_v63  ;;  %v2331_v42 = vpop.permute.xlu0 %2330  ;;  %v3126_v22 = vld [vmem:[%s3717_s6] sm:$0xff]  }
 0x2fa   : > { %v1743_v29 = vadd.f32 %v1738_v6, %v1715_v24  ;;  %v1746_v45 = vmax.f32 %v1742_v23, 0.0 }
 0x2fb   : > { %v1741_v30 = vadd.f32 %v1728_v4, %v1713_v27  ;;  %v1744_v13 = vmax.f32 %v1740_v26, 0.0 }
 0x2fc   : > { %v1747_v33 = vmax.f32 %v1743_v29, 0.0  ;;  %v3127_v29 = vld [vmem:[%s3717_s6 + $0x10] sm:$0xff]  }
 0x2fd   : > { %v1745_v34 = vmax.f32 %v1741_v30, 0.0  ;;  %v1809_v63 = vpop.permute.xlu0 %1808  ;;  %v2763_v30 = vld [vmem:[%s3721_s10 + $0x4] sm:$0x1] }
 0x2fe   : > { %v1755_v25 = vpack.c.bf16 %v1747_v33, %v1746_v45  ;;  %v2107_v33 = vpack.i.b16 %v2763_v30, %v2763_v30 }
 0x2ff   : > { %v1754_v35 = vpack.c.bf16 %v1745_v34, %v1744_v13 }
 0x300   : > { %1757 = vst.msk [vmem:[#allocation3 + $0x20] sm:$0xff] %vm535_vm1, %v1755_v25  ;;  %v2112_v25 = vrot.slane %v2107_v33, %v3248_v9 }
 0x301   : > { %1756 = vst.msk [vmem:[#allocation3 + $0x8] sm:$0xff] %vm535_vm1, %v1754_v35 }
 0x307   : > { %v3570_v38 = vld [vmem:[#allocation3 + $0x20] sm:$0xff] }
 0x308   : > { %v3567_v36 = vld [vmem:[#allocation3 + $0x8] sm:$0xff]  ;;  %v2182_v41 = vmul.bf16 %v2179_v32, %v3570_v38  ;;  %v1798_v44 = vmul.bf16 %v1793_v53, %v3570_v38  ;;  %v2334_v49 = vmul.bf16 %v2331_v42, %v3570_v38  ;;  %v1779_v39 = vmul.bf16 %v1774_v10, %v3570_v38 }
 0x309   : > { %v2181_v37 = vmul.bf16 %v2179_v32, %v3567_v36  ;;  %v1796_v40 = vmul.bf16 %v1793_v53, %v3567_v36  ;;  %v2333_v46 = vmul.bf16 %v2331_v42, %v3567_v36  ;;  %v1777_v48 = vmul.bf16 %v1774_v10, %v3567_v36  ;;  %v1813_v53 = vpop.permute.xlu0 %1812  ;;  %v3128_v32 = vld [vmem:[%s3717_s6 + $0x18] sm:$0xff]  }
 0x30a   : > { %v1946_v50 = vmul.bf16 %v1943_v8, %v3567_v36  ;;  %v1948_v59 = vmul.bf16 %v1943_v8, %v3570_v38  ;;  %v2032_v51 = vmul.bf16 %v2029_v14, %v3567_v36  ;;  %v2034_v52 = vmul.bf16 %v2029_v14, %v3570_v38  ;;  %v3125_v14 = vld [vmem:[%s3717_s6 + $0x28] sm:$0xff]  }
 0x30b   : > { %2190 = vrot.lane.b32.xlu0 %v2181_v37, %s3149_s21  ;;  %1810 = vrot.lane.b32.xlu1 %v1796_v40, %s3152_s15  ;;  %v2257_v55 = vmul.bf16 %v2255_v54, %v3567_v36  ;;  %v2258_v56 = vmul.bf16 %v2255_v54, %v3570_v38  ;;  %v2409_v58 = vmul.bf16 %v2407_v57, %v3567_v36 }
 0x30c   : > { %v2410_v60 = vmul.bf16 %v2407_v57, %v3570_v38  ;;  %v2113_v37 = vmul.bf16 %v2112_v25, %v3567_v36  ;;  %v2114_v9 = vmul.bf16 %v2112_v25, %v3570_v38  ;;  %v3130_v36 = vld [vmem:[%s3717_s6 + $0x30] sm:$0xff]  }
 0x30d   : > { %v1875_v1 = vpop.permute.xlu0 %1874 }
 0x30f   : > { %2192 = vrot.lane.b32.xlu0 %v2182_v41, %s3149_s21  ;;  %1814 = vrot.lane.b32.xlu1 %v1798_v44, %s3152_s15  ;;  %v3129_v41 = vld [vmem:[%s3717_s6 + $0x20] sm:$0xff]  }
 0x311   : > { %v1879_v28 = vpop.permute.xlu0 %1878 }
 0x313   : > { %2342 = vrot.lane.b32.xlu0 %v2333_v46, %s3148_s20  ;;  %1876 = vrot.lane.b32.xlu1 %v1777_v48, %s3150_s26  ;;  %v3132_v46 = vld [vmem:[%s3717_s6 + $0x40] sm:$0xff]  }
 0x315   : > { %v1959_v3 = vpop.permute.xlu0 %1958 }
 0x317   : > { %2344 = vrot.lane.b32.xlu0 %v2334_v49, %s3148_s20  ;;  %1880 = vrot.lane.b32.xlu1 %v1779_v39, %s3150_s26 }
 0x319   : > { %v1963_v4 = vpop.permute.xlu0 %1962 }
 0x31b   : > { %2474 = vperm.xlu0 %3095, %v2470_v43   ;;  %1960 = vrot.lane.b32.xlu1 %v1946_v50, %s3153_s22 }
 0x31d   : > { %v2045_v6 = vpop.permute.xlu0 %2044 }
 0x31f   : > { %2493 = vperm.xlu0 %3095, %v2489_v31   ;;  %1964 = vrot.lane.b32.xlu1 %v1948_v59, %s3153_s22 }
 0x321   : > { %v2049_v10 = vpop.permute.xlu0 %2048 }
 0x323   : > { %2046 = vrot.lane.b32.xlu1 %v2032_v51, %s3151_s27 }
 0x327   : > { %2050 = vrot.lane.b32.xlu1 %v2034_v52, %s3151_s27 }
 0x32b   : > { %2266 = vrot.lane.b32.xlu1 %v2257_v55, %s3147_s19 }
 0x32f   : > { %2268 = vrot.lane.b32.xlu1 %v2258_v56, %s3147_s19 }
 0x333   : > { %2418 = vrot.lane.b32.xlu1 %v2409_v58, %s3146_s16 }
 0x337   : > { %2420 = vrot.lane.b32.xlu1 %v2410_v60, %s3146_s16 }
 0x33b   : > { %2479 = vperm.xlu1 %3096, %v2471_v61  }
 0x33f   : > { %2498 = vperm.xlu1 %3096, %v2490_v62  }
 0x37d   : > { %v2191_v5 = vpop.permute.xlu0 %2190  ;;  %v1811_v0 = vpop.permute.xlu1 %1810 }
 0x37e   : > { %2974 = vmatpush3.bf16.msra.mxu1 %v2191_v5  ;;  %v1816_v8 = vsel %vm702_vm3, %v1809_v63, %v1811_v0 }
 0x37f   : > { %2975 = vmatprep.subr.bf16.mxu1 %v3143_v2  ;;  %2934 = vmatpush3.bf16.msra.mxu0 %v1816_v8 }
 0x380   : > { %2935 = vmatprep.subr.bf16.mxu0 %v3143_v2 }
 0x381   : > { %v2193_v11 = vpop.permute.xlu0 %2192  ;;  %v1815_v15 = vpop.permute.xlu1 %1814 }
 0x382   : > { %2976 = vmatpush3.bf16.msra.mxu1 %v2193_v11  ;;  %v1817_v16 = vsel %vm702_vm3, %v1813_v53, %v1815_v15 }
 0x383   : > { %2989 = vmatprep.subr.bf16.mxu1 %v3143_v2  ;;  %2936 = vmatpush3.bf16.msra.mxu0 %v1817_v16 }
 0x384   : > { %2941 = vmatprep.subr.bf16.mxu0 %v3143_v2 }
 0x385   : > { %v2343_v47 = vpop.permute.xlu0 %2342  ;;  %2978 = vmatmul.mubr.msk.bf16.vlgmr.msra.gmra.mrb[4].mxu1 %vm1820_vm6, %v3125_v14  ;;  %v1877_v17 = vpop.permute.xlu1 %1876 }
 0x386   : > { %2990 = vmatpush3.bf16.msra.mxu1 %v2343_v47  ;;  %2993 = vmatprep.mubr.msk.bf16.mxu1 %vm3144_vm0, %v3143_v2  ;;  %v1882_v18 = vsel %vm608_vm2, %v1875_v1, %v1877_v17 }
 0x387   : > { %2938 = vmatmul.mubr.msk.bf16.vlgmr.msra.gmra.mrb[4].mxu0 %vm1820_vm6, %v3124_v7  ;;  %2991 = vmatprep.subr.bf16.mxu1 %v3143_v2 }
 0x388   : > { %2942 = vmatpush3.bf16.msra.mxu0 %v1882_v18  ;;  %2945 = vmatprep.mubr.msk.bf16.mxu0 %vm3144_vm0, %v3143_v2 }
 0x389   : > { %v2345_v19 = vpop.permute.xlu0 %2344  ;;  %2943 = vmatprep.subr.bf16.mxu0 %v3143_v2  ;;  %v1881_v20 = vpop.permute.xlu1 %1880 }
 0x38a   : > { %2992 = vmatpush3.bf16.msra.mxu1 %v2345_v19  ;;  %v1883_v21 = vsel %vm608_vm2, %v1879_v28, %v1881_v20 }
 0x38b   : > { %3005 = vmatprep.subr.bf16.mxu1 %v3143_v2 }
 0x38c   : > { %2944 = vmatpush3.bf16.msra.mxu0 %v1883_v21 }
 0x38d   : > { %2949 = vmatprep.subr.bf16.mxu0 %v3143_v2  ;;  %2994 = vmatmul.mubr.msk.bf16.vlgmr.msra.gmra.mrb[8].mxu1 %vm1820_vm6, %v3131_v12  ;;  %v1961_v23 = vpop.permute.xlu1 %1960 }
 0x38e   : > { %3007 = vmatprep.mubr.msk.bf16.mxu1 %vm3144_vm0, %v3143_v2  ;;  %v1966_v24 = vsel %vm838_vm4, %v1959_v3, %v1961_v23 }
 0x38f   : > { %2946 = vmatmul.mubr.msk.bf16.vlgmr.msra.gmra.mrb[8].mxu0 %vm1820_vm6, %v3126_v22 }
 0x390   : > { %2950 = vmatpush3.bf16.msra.mxu0 %v1966_v24  ;;  %2953 = vmatprep.mubr.msk.bf16.mxu0 %vm3144_vm0, %v3143_v2 }
 0x391   : > { %2951 = vmatprep.subr.bf16.mxu0 %v3143_v2  ;;  %v1965_v26 = vpop.permute.xlu1 %1964 }
 0x392   : > { %v1967_v27 = vsel %vm838_vm4, %v1963_v4, %v1965_v26 }
 0x394   : > { %2952 = vmatpush3.bf16.msra.mxu0 %v1967_v27 }
 0x395   : > { %2957 = vmatprep.subr.bf16.mxu0 %v3143_v2  ;;  %v2047_v45 = vpop.permute.xlu1 %2046 }
 0x396   : > { %v2052_v13 = vsel %vm974_vm5, %v2045_v6, %v2047_v45 }
 0x397   : > { %2954 = vmatmul.mubr.msk.bf16.vlgmr.msra.gmra.mrb[12].mxu0 %vm1820_vm6, %v3127_v29 }
 0x398   : > { %2958 = vmatpush3.bf16.msra.mxu0 %v2052_v13  ;;  %2961 = vmatprep.mubr.msk.bf16.mxu0 %vm3144_vm0, %v3143_v2 }
 0x399   : > { %2959 = vmatprep.subr.bf16.mxu0 %v3143_v2  ;;  %v2051_v34 = vpop.permute.xlu1 %2050 }
 0x39a   : > { %v2053_v35 = vsel %vm974_vm5, %v2049_v10, %v2051_v34  ;;  %v2475_v33 = vpop.permute.xlu0 %2474 }
 0x39c   : > { %2960 = vmatpush3.bf16.msra.mxu0 %v2053_v35 }
 0x39d   : > { %2965 = vmatprep.subr.bf16.mxu0 %v3143_v2  ;;  %v2267_v40 = vpop.permute.xlu1 %2266 }
 0x39f   : > { %2962 = vmatmul.mubr.msk.bf16.vlgmr.msra.gmra.mrb[16].mxu0 %vm1820_vm6, %v3128_v32 }
 0x3a0   : > { %2966 = vmatpush3.bf16.msra.mxu0 %v2113_v37  ;;  %2969 = vmatprep.mubr.msk.bf16.mxu0 %vm3144_vm0, %v3143_v2 }
 0x3a1   : > { %2967 = vmatprep.subr.bf16.mxu0 %v3143_v2  ;;  %v2269_v42 = vpop.permute.xlu1 %2268 }
 0x3a4   : > { %2968 = vmatpush3.bf16.msra.mxu0 %v2114_v9 }
 0x3a5   : > { %2981 = vmatprep.subr.bf16.mxu0 %v3143_v2  ;;  %v2419_v38 = vpop.permute.xlu1 %2418 }
 0x3a7   : > { %2970 = vmatmul.mubr.msk.bf16.vlgmr.msra.gmra.mrb[20].mxu0 %vm1820_vm6, %v3129_v41 }
 0x3a8   : > { %2982 = vmatpush3.bf16.msra.mxu0 %v2267_v40  ;;  %2985 = vmatprep.mubr.msk.bf16.mxu0 %vm3144_vm0, %v3143_v2 }
 0x3a9   : > { %2983 = vmatprep.subr.bf16.mxu0 %v3143_v2  ;;  %v2421_v44 = vpop.permute.xlu1 %2420 }
 0x3ac   : > { %2984 = vmatpush3.bf16.msra.mxu0 %v2269_v42  ;;  %v3133_v42 = vld [vmem:[%s3719_s8] sm:$0xff]  }
 0x3ad   : > { %2997 = vmatprep.subr.bf16.mxu0 %v3143_v2 }
 0x3af   : > { %2986 = vmatmul.mubr.msk.bf16.vlgmr.msra.gmra.mrb[24].mxu0 %vm1820_vm6, %v3130_v36  ;;  %v2494_v36 = vpop.permute.xlu0 %2493 }
 0x3b0   : > { %2998 = vmatpush3.bf16.msra.mxu0 %v2419_v38  ;;  %3001 = vmatprep.mubr.msk.bf16.mxu0 %vm3144_vm0, %v3143_v2 }
 0x3b1   : > { %2999 = vmatprep.subr.bf16.mxu0 %v3143_v2 }
 0x3b4   : > { %3000 = vmatpush3.bf16.msra.mxu0 %v2421_v44 }
 0x3b7   : > { %3002 = vmatmul.mubr.msk.bf16.vlgmr.msra.gmra.mrb[28].mxu0 %vm1820_vm6, %v3132_v46 }
 0x3ba   : > { %v2480_v32 = vpop.permute.xlu1 %2479 }
 0x458   : > { %v2233_v48 = vpop.f32.mrb[4].mxu1 }
 0x459   : > { %v2979_v49 = vpop.f32.mrb[5].mxu1 }
 0x45a   : > { %v1858_v39 = vpop.f32.mrb[4].mxu0  ;;  %v2236_v43 = vpop.f32.mrb[6].mxu1 }
 0x45b   : > { %v2939_v50 = vpop.f32.mrb[5].mxu0  ;;  %v2980_v31 = vpop.f32.mrb[7].mxu1 }
 0x45c   : > { %v1861_v59 = vpop.f32.mrb[6].mxu0 }
 0x45d   : > { %v2940_v51 = vpop.f32.mrb[7].mxu0 }
 0x460   : > { %v2385_v52 = vpop.f32.mrb[8].mxu1 }
 0x461   : > { %v2995_v54 = vpop.f32.mrb[9].mxu1 }
 0x462   : > { %v1923_v55 = vpop.f32.mrb[8].mxu0  ;;  %v2388_v2 = vpop.f32.mrb[10].mxu1 }
 0x463   : > { %v1924_v56 = vadd.f32 %v1923_v55, %v1858_v39  ;;  %v2947_v57 = vpop.f32.mrb[9].mxu0  ;;  %v2996_v58 = vpop.f32.mrb[11].mxu1 }
 0x464   : > { %v1926_v60 = vpop.f32.mrb[10].mxu0 }
 0x465   : > { %v1927_v61 = vadd.f32 %v1926_v60, %v1861_v59  ;;  %v2948_v62 = vpop.f32.mrb[11].mxu0 }
 0x46a   : > { %v2007_v63 = vpop.f32.mrb[12].mxu0 }
 0x46b   : > { %v2014_v53 = vadd.f32 %v2007_v63, %v1924_v56  ;;  %v2955_v1 = vpop.f32.mrb[13].mxu0 }
 0x46c   : > { %v2010_v28 = vpop.f32.mrb[14].mxu0 }
 0x46d   : > { %v2015_v3 = vadd.f32 %v2010_v28, %v1927_v61  ;;  %v2956_v4 = vpop.f32.mrb[15].mxu0 }
 0x472   : > { %v2093_v6 = vpop.f32.mrb[16].mxu0 }
 0x473   : > { %v2100_v10 = vadd.f32 %v2093_v6, %v2014_v53  ;;  %v2963_v5 = vpop.f32.mrb[17].mxu0 }
 0x474   : > { %v2096_v0 = vpop.f32.mrb[18].mxu0 }
 0x475   : > { %v2101_v8 = vadd.f32 %v2096_v0, %v2015_v3  ;;  %v2964_v11 = vpop.f32.mrb[19].mxu0 }
 0x47a   : > { %v2157_v14 = vpop.f32.mrb[20].mxu0 }
 0x47b   : > { %v2164_v15 = vadd.f32 %v2157_v14, %v2100_v10  ;;  %v2971_v16 = vpop.f32.mrb[21].mxu0 }
 0x47c   : > { %v2160_v7 = vpop.f32.mrb[22].mxu0 }
 0x47d   : > { %v2165_v47 = vadd.f32 %v2160_v7, %v2101_v8  ;;  %v2240_v17 = vadd.f32 %v2233_v48, %v2164_v15  ;;  %v2972_v18 = vpop.f32.mrb[23].mxu0  ;;  %v2499_v48 = vpop.permute.xlu1 %2498 }
 0x47f   : > { %v2241_v19 = vadd.f32 %v2236_v43, %v2165_v47 }
 0x482   : > { %v2309_v12 = vpop.f32.mrb[24].mxu0 }
 0x483   : > { %v2316_v20 = vadd.f32 %v2309_v12, %v2240_v17  ;;  %v2987_v21 = vpop.f32.mrb[25].mxu0 }
 0x484   : > { %v2312_v22 = vpop.f32.mrb[26].mxu0 }
 0x485   : > { %v2317_v23 = vadd.f32 %v2312_v22, %v2241_v19  ;;  %v2392_v24 = vadd.f32 %v2385_v52, %v2316_v20  ;;  %v2988_v26 = vpop.f32.mrb[27].mxu0 }
 0x487   : > { %v2393_v27 = vadd.f32 %v2388_v2, %v2317_v23 }
 0x48a   : > { %v2461_v29 = vpop.f32.mrb[28].mxu0 }
 0x48b   : > { %v2468_v30 = vadd.f32 %v2461_v29, %v2392_v24  ;;  %v3003_v45 = vpop.f32.mrb[29].mxu0 }
 0x48c   : > { %v2464_v13 = vpop.f32.mrb[30].mxu0 }
 0x48d   : > { %v2482_v34 = vadd.f32 %v2475_v33, %v2468_v30  ;;  %v2469_v25 = vadd.f32 %v2464_v13, %v2393_v27  ;;  %v3004_v35 = vpop.f32.mrb[31].mxu0 }
 0x48f   : > { %v2483_v37 = vadd.f32 %v2480_v32, %v2469_v25  ;;  %v2484_v40 = vmax.f32 %v2482_v34, 0.0 }
 0x491   : > { %v2485_v9 = vmax.f32 %v2483_v37, 0.0 }
 0x493   : > { %v2488_v41 = vpack.c.bf16 %v2485_v9, %v2484_v40 }
 0x495   : > { %3006 = vmatpush3.bf16.msra.mxu1 %v2488_v41 }
 0x498   : > { %3008 = vmatmul.mubr.msk.bf16.vlgmr.msra.gmra.mrb[12].mxu1 %vm535_vm1, %v3133_v42 }
 0x56b   : > { %v2543_v38 = vpop.f32.mrb[12].mxu1 }
 0x56c   : > { %v2544_v44 = vadd.f32 %v2543_v38, %v2494_v36  ;;  %v3009_v46 = vpop.f32.mrb[13].mxu1 }
 0x56d   : > { %v2546_v49 = vpop.f32.mrb[14].mxu1 }
 0x56e   : > { %2550 = vst.msk [vmem:[%s406_s12] sm:$0xff] %vm535_vm1, %v2544_v44  ;;  %v2547_v39 = vadd.f32 %v2546_v49, %v2499_v48  ;;  %v3010_v43 = vpop.f32.mrb[15].mxu1 }
 0x570   : > { %2551 = vst.msk [vmem:[%s406_s12 + $0x8] sm:$0xff] %vm535_vm1, %v2547_v39 }
 0x571 PF: > { %s21_s17 = sadd.s32 1, %s3141_s17  }
 0x572   : > { %p18_p4 = scmp.ge.s32.totalorder %s21_s17, 4  }
 0x574   :  { %20 = sbr.rel (!%p18_p4) target bundleno = 1 (0x1), region = 129 }

</bundles_post_ra>
